<compile_context>
chip_gen: v7x
topology: tpu7x:2x2x1
jax: 0.10.0
libtpu: 0.0.40
codegen_flags: <defaults>
</compile_context>

<pallas_src>
import functools
import math

import jax
import jax.numpy as jnp
from jax.experimental import pallas as pl
from jax.experimental.pallas import tpu as pltpu


# ----------------------------------------------------------------------------
# In-kernel helpers
# ----------------------------------------------------------------------------
def _gelu_tanh(x):
    # TODO(synk): PyTorch nn.GELU() is the exact erf GELU; the tanh
    # approximation (max abs error ~3e-4) is used because tanh lowers to the
    # EUP on every Mosaic TPU target.
    c = math.sqrt(2.0 / math.pi)
    return 0.5 * x * (1.0 + jnp.tanh(c * (x + 0.044715 * x * x * x)))


def _layernorm(x, gamma, beta, eps=1e-5):
    mu = jnp.mean(x, axis=-1, keepdims=True)
    xc = x - mu
    var = jnp.mean(xc * xc, axis=-1, keepdims=True)
    return xc * jax.lax.rsqrt(var + eps) * gamma + beta


# ----------------------------------------------------------------------------
# Fused transformer-block kernel: one grid step == Bt batch elements.
# Dense matmuls (QKV, out-proj, FFN) run over the flattened (Bt*S, D) tile so
# the MXU M dimension is filled; attention stays batch/head separated in a
# small static loop. x is read once from HBM and written once.
# ----------------------------------------------------------------------------
def _transformer_block_kernel(
    x_ref,
    ln1_g_ref, ln1_b_ref,
    wq_ref, bq_ref, wk_ref, bk_ref, wv_ref, bv_ref, wo_ref, bo_ref,
    ln2_g_ref, ln2_b_ref,
    w1_ref, b1_ref, w2_ref, b2_ref,
    o_ref,
    attn_scratch,                       # VMEM (Bt*S, num_heads*v_dim) f32
    *, batch_tile, seq_len, num_heads, attn_dim, v_dim,
):
    f32 = jnp.float32
    bf16 = jnp.bfloat16
    M = batch_tile * seq_len
    D = x_ref.shape[-1]

    x = x_ref[...].astype(f32).reshape(M, D)                      # [Bt*S, D]

    # ---- pre-norm + QKV projections (bf16 operands, f32 accumulation) ------
    xn = _layernorm(x, ln1_g_ref[...], ln1_b_ref[...]).astype(bf16)
    q = (jnp.dot(xn, wq_ref[...], preferred_element_type=f32) + bq_ref[...]).astype(bf16)
    k = (jnp.dot(xn, wk_ref[...], preferred_element_type=f32) + bk_ref[...]).astype(bf16)
    v = (jnp.dot(xn, wv_ref[...], preferred_element_type=f32) + bv_ref[...]).astype(bf16)

    # ---- scaled dot-product attention: static loop over (batch, head) ------
    # TODO(synk): full [S, S] scores per (batch, head) are kept in VMEM; long
    #             sequences would need a flash-style online-softmax KV split.
    scale = 1.0 / math.sqrt(attn_dim)
    for b in range(batch_tile):
        r0 = b * seq_len
        for h in range(num_heads):
            qh = q[r0:r0 + seq_len, h * attn_dim:(h + 1) * attn_dim]
            kh = k[r0:r0 + seq_len, h * attn_dim:(h + 1) * attn_dim]
            vh = v[r0:r0 + seq_len, h * v_dim:(h + 1) * v_dim]
            logits = jax.lax.dot_general(                          # q @ k^T
                qh, kh, (((1,), (1,)), ((), ())),
                preferred_element_type=f32) * scale                # [S, S] f32
            logits = logits - jnp.max(logits, axis=-1, keepdims=True)
            p = jnp.exp(logits)
            p = p * pl.reciprocal(jnp.sum(p, axis=-1, keepdims=True), approx=True)
            hv = jnp.dot(p.astype(bf16), vh, preferred_element_type=f32)
            # No lane-axis concat: write head output at static offsets.
            attn_scratch[r0:r0 + seq_len, h * v_dim:(h + 1) * v_dim] = hv

    # ---- out-projection over the tall (Bt*S, H*v_dim) slab -----------------
    o = jnp.dot(attn_scratch[...].astype(bf16), wo_ref[...],
                preferred_element_type=f32) + bo_ref[...]
    # TODO(synk): nn.Dropout(drop_prob) is the identity at inference; the
    #             training-mode random mask is not implemented.
    x1 = x + o

    # ---- pre-norm + feed-forward (Linear -> GELU -> Linear) ----------------
    xn2 = _layernorm(x1, ln2_g_ref[...], ln2_b_ref[...]).astype(bf16)
    h1 = jnp.dot(xn2, w1_ref[...], preferred_element_type=f32) + b1_ref[...]
    h1 = _gelu_tanh(h1).astype(bf16)
    ff = jnp.dot(h1, w2_ref[...], preferred_element_type=f32) + b2_ref[...]

    o_ref[...] = (x1 + ff).reshape(batch_tile, seq_len, D).astype(o_ref.dtype)


# ----------------------------------------------------------------------------
# Batch-tile chooser
# ----------------------------------------------------------------------------
def _choose_batch_tile(B, S, *, target_rows=256, max_rows=2048):
    """Per-grid-step batch tile Bt (a divisor of B).

    Aim for Bt*S >= 256 so the dense matmuls fill the 256-row MXU (v6e/v7x),
    keep >= 2 grid steps when B allows (v7x has 2 TensorCores), and cap the
    per-step row count so the VMEM-resident activations stay modest.
    """
    divisors = [d for d in range(1, B + 1) if B % d == 0]
    best = divisors[-1]
    for d in divisors:                      # smallest divisor filling the MXU
        if d * S >= target_rows:
            best = d
            break
    # Prefer >= 2 grid steps if that does not drop below the fill target, or
    # if the whole problem is too small to fill it anyway.
    if B // best < 2:
        for d in reversed(divisors):
            if B // d >= 2 and (d * S >= target_rows or B * S < 2 * target_rows):
                best = d
                break
    while best * S > max_rows and best > 1:
        best = max(d for d in divisors if d < best)
    return best


# ----------------------------------------------------------------------------
# Wrapper
# ----------------------------------------------------------------------------
def relative_transformer_forward(x, H, W, params, *, num_heads, attn_dim, v_dim):
    """Pallas implementation of RelativeTransformer.forward(x, H, W)."""
    del H, W                                      # unused by the reference forward
    B, S, D = x.shape
    bt = _choose_batch_tile(B, S)
    num_blocks = B // bt

    def row(p):                                   # 1-D params -> lane-dense (1, N)
        return p.reshape(1, -1).astype(jnp.float32)

    def mat(p):                                   # nn.Linear [out,in] -> bf16 [in,out]
        return p.T.astype(jnp.bfloat16)           # full-rate MXU, half the HBM bytes

    inputs = (
        x,
        row(params["mha_norm"]["weight"]), row(params["mha_norm"]["bias"]),
        mat(params["query"]["weight"]),    row(params["query"]["bias"]),
        mat(params["key"]["weight"]),      row(params["key"]["bias"]),
        mat(params["value"]["weight"]),    row(params["value"]["bias"]),
        mat(params["linear"]["weight"]),   row(params["linear"]["bias"]),
        row(params["ff_norm"]["weight"]),  row(params["ff_norm"]["bias"]),
        mat(params["ff1"]["weight"]),      row(params["ff1"]["bias"]),
        mat(params["ff2"]["weight"]),      row(params["ff2"]["bias"]),
    )

    def resident_spec(a):
        # Whole-array block, constant index -> weights stay VMEM-resident.
        # Single-buffered: double-buffering a constant block only doubles VMEM.
        return pl.BlockSpec(a.shape, lambda b: (0,) * a.ndim,
                            pipeline_mode=pl.Buffered(1))

    in_specs = [pl.BlockSpec((bt, S, D), lambda b: (b, 0, 0))]
    in_specs += [resident_spec(a) for a in inputs[1:]]

    kernel = functools.partial(
        _transformer_block_kernel,
        batch_tile=bt, seq_len=S,
        num_heads=num_heads, attn_dim=attn_dim, v_dim=v_dim)

    return pl.pallas_call(
        kernel,
        out_shape=jax.ShapeDtypeStruct((B, S, D), x.dtype),
        grid=(num_blocks,),
        in_specs=in_specs,
        out_specs=pl.BlockSpec((bt, S, D), lambda b: (b, 0, 0)),
        scratch_shapes=[pltpu.VMEM((bt * S, num_heads * v_dim), jnp.float32)],
        compiler_params=pltpu.CompilerParams(
            # Batch-block axis is independent -> shard across TensorCores (v7x).
            dimension_semantics=("parallel",),
            # Explicit scoped-VMEM limit (v5e default is only 16 MiB); raise
            # further when emb_dim / S grow.
            vmem_limit_bytes=32 * 1024 * 1024),
    )(*inputs)


# ----------------------------------------------------------------------------
# Deterministic parameter construction (shapes from the PyTorch __init__s)
# ----------------------------------------------------------------------------
def init_params(key, emb_dim, attn_dim, v_dim, num_heads, dtype=jnp.float32):
    in_dim = emb_dim * num_heads
    keys = jax.random.split(key, 12)

    def linear(kw, kb, fan_in, fan_out):
        # Mirrors nn.Linear's uniform(-1/sqrt(fan_in), 1/sqrt(fan_in)) init.
        # Weights are snapped to the bf16 grid so the f32 reference isolates
        # kernel math from the deliberate bf16 weight cast inside the wrapper.
        bound = 1.0 / math.sqrt(fan_in)
        w = jax.random.uniform(kw, (fan_out, fan_in), dtype, -bound, bound)
        w = w.astype(jnp.bfloat16).astype(dtype)
        b = jax.random.uniform(kb, (fan_out,), dtype, -bound, bound)
        return {"weight": w, "bias": b}

    def layernorm(dim):
        return {"weight": jnp.ones((dim,), dtype), "bias": jnp.zeros((dim,), dtype)}

    return {
        "mha_norm": layernorm(emb_dim),
        "query":  linear(keys[0],  keys[1],  in_dim, attn_dim * num_heads),
        "key":    linear(keys[2],  keys[3],  in_dim, attn_dim * num_heads),
        "value":  linear(keys[4],  keys[5],  in_dim, v_dim * num_heads),
        "linear": linear(keys[6],  keys[7],  in_dim, v_dim * num_heads),
        "ff_norm": layernorm(emb_dim),
        "ff1":    linear(keys[8],  keys[9],  emb_dim, emb_dim * 4),
        "ff2":    linear(keys[10], keys[11], emb_dim * 4, emb_dim),
    }


# ----------------------------------------------------------------------------
# Pure-JAX reference (same intended semantics, f32 HIGHEST) for verification
# ----------------------------------------------------------------------------
def reference_forward(x, params, *, num_heads, attn_dim, v_dim):
    hp = jax.lax.Precision.HIGHEST

    def ln(z, p):
        mu = jnp.mean(z, -1, keepdims=True)
        var = jnp.mean((z - mu) ** 2, -1, keepdims=True)
        return (z - mu) / jnp.sqrt(var + 1e-5) * p["weight"] + p["bias"]

    def lin(z, p):
        return jnp.einsum("...i,oi->...o", z, p["weight"], precision=hp) + p["bias"]

    B, S, _ = x.shape
    xn = ln(x, params["mha_norm"])
    q = lin(xn, params["query"]).reshape(B, S, num_heads, attn_dim).transpose(0, 2, 1, 3)
    k = lin(xn, params["key"]).reshape(B, S, num_heads, attn_dim).transpose(0, 2, 1, 3)
    v = lin(xn, params["value"]).reshape(B, S, num_heads, v_dim).transpose(0, 2, 1, 3)
    logits = jnp.einsum("bhqd,bhkd->bhqk", q, k, precision=hp) / jnp.sqrt(jnp.float32(attn_dim))
    attn = jax.nn.softmax(logits, axis=-1)
    o = jnp.einsum("bhqk,bhkd->bhqd", attn, v, precision=hp)
    o = o.transpose(0, 2, 1, 3).reshape(B, S, num_heads * v_dim)
    x1 = x + lin(o, params["linear"])
    xn2 = ln(x1, params["ff_norm"])
    h = _gelu_tanh(lin(xn2, params["ff1"]))
    return x1 + lin(h, params["ff2"])


# ----------------------------------------------------------------------------
# Demo / self-test
# ----------------------------------------------------------------------------
if __name__ == "__main__":
    # Only shape-consistent configuration of the reference module:
    emb_dim = attn_dim = v_dim = 128     # lane-dense model dim (multiple of 128)
    num_heads = 1
    B, Hh, Ww = 4, 4, 4
    S = Hh * Ww                           # seq length implied by spatial H*W
    D = emb_dim * num_heads               # 128

    key = jax.random.PRNGKey(0)
    k_x, k_p = jax.random.split(key)
    x = jax.random.normal(k_x, (B, S, D), dtype=jnp.float32)
    params = init_params(k_p, emb_dim, attn_dim, v_dim, num_heads)

    out = relative_transformer_forward(
        x, Hh, Ww, params, num_heads=num_heads, attn_dim=attn_dim, v_dim=v_dim)
    out = jax.block_until_ready(out)

    ref = reference_forward(x, params, num_heads=num_heads,
                            attn_dim=attn_dim, v_dim=v_dim)

    assert out.shape == x.shape and out.dtype == x.dtype
    max_err = float(jnp.max(jnp.abs(out - ref)))
    # bf16 MXU operands + tanh-GELU + approx reciprocal vs f32 HIGHEST reference.
    assert jnp.allclose(out, ref, rtol=1e-2, atol=1e-2), max_err

    print("KERNEL_OK")
</pallas_src>

<mosaic_0001>
module attributes {stable_mosaic.version = 11 : i64} {
  func.func @_transformer_block_kernel(%arg0: i32, %arg1: memref<2x16x128xf32, #tpu.memory_space<vmem>>, %arg2: memref<1x128xf32, #tpu.memory_space<vmem>>, %arg3: memref<1x128xf32, #tpu.memory_space<vmem>>, %arg4: memref<128x128xbf16, #tpu.memory_space<vmem>>, %arg5: memref<1x128xf32, #tpu.memory_space<vmem>>, %arg6: memref<128x128xbf16, #tpu.memory_space<vmem>>, %arg7: memref<1x128xf32, #tpu.memory_space<vmem>>, %arg8: memref<128x128xbf16, #tpu.memory_space<vmem>>, %arg9: memref<1x128xf32, #tpu.memory_space<vmem>>, %arg10: memref<128x128xbf16, #tpu.memory_space<vmem>>, %arg11: memref<1x128xf32, #tpu.memory_space<vmem>>, %arg12: memref<1x128xf32, #tpu.memory_space<vmem>>, %arg13: memref<1x128xf32, #tpu.memory_space<vmem>>, %arg14: memref<128x512xbf16, #tpu.memory_space<vmem>>, %arg15: memref<1x512xf32, #tpu.memory_space<vmem>>, %arg16: memref<512x128xbf16, #tpu.memory_space<vmem>>, %arg17: memref<1x128xf32, #tpu.memory_space<vmem>>, %arg18: memref<2x16x128xf32, #tpu.memory_space<vmem>>, %arg19: memref<32x128xf32, #tpu.memory_space<vmem>>) attributes {dimension_semantics = [#tpu.dimension_semantics<parallel>], iteration_bounds = array<i64: 2>, scalar_prefetch = 0 : i64, scratch_operands = 1 : i64, tpu.core_type = #tpu.core_type<tc>, window_params = [{transform_indices = @transform_0, window_bounds = array<i64: 2, 16, 128>}, {pipeline_mode = #tpu.pipeline_mode<synchronous>, transform_indices = @transform_1, window_bounds = array<i64: 1, 128>}, {pipeline_mode = #tpu.pipeline_mode<synchronous>, transform_indices = @transform_2, window_bounds = array<i64: 1, 128>}, {pipeline_mode = #tpu.pipeline_mode<synchronous>, transform_indices = @transform_3, window_bounds = array<i64: 128, 128>}, {pipeline_mode = #tpu.pipeline_mode<synchronous>, transform_indices = @transform_4, window_bounds = array<i64: 1, 128>}, {pipeline_mode = #tpu.pipeline_mode<synchronous>, transform_indices = @transform_5, window_bounds = array<i64: 128, 128>}, {pipeline_mode = #tpu.pipeline_mode<synchronous>, transform_indices = @transform_6, window_bounds = array<i64: 1, 128>}, {pipeline_mode = #tpu.pipeline_mode<synchronous>, transform_indices = @transform_7, window_bounds = array<i64: 128, 128>}, {pipeline_mode = #tpu.pipeline_mode<synchronous>, transform_indices = @transform_8, window_bounds = array<i64: 1, 128>}, {pipeline_mode = #tpu.pipeline_mode<synchronous>, transform_indices = @transform_9, window_bounds = array<i64: 128, 128>}, {pipeline_mode = #tpu.pipeline_mode<synchronous>, transform_indices = @transform_10, window_bounds = array<i64: 1, 128>}, {pipeline_mode = #tpu.pipeline_mode<synchronous>, transform_indices = @transform_11, window_bounds = array<i64: 1, 128>}, {pipeline_mode = #tpu.pipeline_mode<synchronous>, transform_indices = @transform_12, window_bounds = array<i64: 1, 128>}, {pipeline_mode = #tpu.pipeline_mode<synchronous>, transform_indices = @transform_13, window_bounds = array<i64: 128, 512>}, {pipeline_mode = #tpu.pipeline_mode<synchronous>, transform_indices = @transform_14, window_bounds = array<i64: 1, 512>}, {pipeline_mode = #tpu.pipeline_mode<synchronous>, transform_indices = @transform_15, window_bounds = array<i64: 512, 128>}, {pipeline_mode = #tpu.pipeline_mode<synchronous>, transform_indices = @transform_16, window_bounds = array<i64: 1, 128>}, {transform_indices = @transform_17, window_bounds = array<i64: 2, 16, 128>}]} {
    %c0 = arith.constant 0 : index
    %c0_0 = arith.constant 0 : index
    %c0_1 = arith.constant 0 : index
    %0 = vector.load %arg1[%c0, %c0_0, %c0_1] : memref<2x16x128xf32, #tpu.memory_space<vmem>>, vector<2x16x128xf32>
    %1 = vector.shape_cast %0 : vector<2x16x128xf32> to vector<32x128xf32>
    %c0_2 = arith.constant 0 : index
    %c0_3 = arith.constant 0 : index
    %2 = vector.load %arg2[%c0_2, %c0_3] : memref<1x128xf32, #tpu.memory_space<vmem>>, vector<1x128xf32>
    %c0_4 = arith.constant 0 : index
    %c0_5 = arith.constant 0 : index
    %3 = vector.load %arg3[%c0_4, %c0_5] : memref<1x128xf32, #tpu.memory_space<vmem>>, vector<1x128xf32>
    %cst = arith.constant dense<0.000000e+00> : vector<32xf32>
    %4 = vector.multi_reduction <add>, %1, %cst [1] : vector<32x128xf32> to vector<32xf32>
    %5 = vector.shape_cast %4 : vector<32xf32> to vector<32x1xf32>
    %cst_6 = arith.constant 1.280000e+02 : f32
    %6 = vector.broadcast %cst_6 : f32 to vector<32x1xf32>
    %7 = arith.divf %5, %6 : vector<32x1xf32>
    %8 = vector.broadcast %7 : vector<32x1xf32> to vector<32x128xf32>
    %9 = arith.subf %1, %8 : vector<32x128xf32>
    %10 = arith.mulf %9, %9 : vector<32x128xf32>
    %cst_7 = arith.constant dense<0.000000e+00> : vector<32xf32>
    %11 = vector.multi_reduction <add>, %10, %cst_7 [1] : vector<32x128xf32> to vector<32xf32>
    %12 = vector.shape_cast %11 : vector<32xf32> to vector<32x1xf32>
    %cst_8 = arith.constant 1.280000e+02 : f32
    %13 = vector.broadcast %cst_8 : f32 to vector<32x1xf32>
    %14 = arith.divf %12, %13 : vector<32x1xf32>
    %cst_9 = arith.constant 9.99999974E-6 : f32
    %15 = vector.broadcast %cst_9 : f32 to vector<32x1xf32>
    %16 = arith.addf %14, %15 : vector<32x1xf32>
    %17 = math.rsqrt %16 : vector<32x1xf32>
    %18 = vector.broadcast %17 : vector<32x1xf32> to vector<32x128xf32>
    %19 = arith.mulf %9, %18 : vector<32x128xf32>
    %20 = vector.broadcast %2 : vector<1x128xf32> to vector<32x128xf32>
    %21 = arith.mulf %19, %20 : vector<32x128xf32>
    %22 = vector.broadcast %3 : vector<1x128xf32> to vector<32x128xf32>
    %23 = arith.addf %21, %22 : vector<32x128xf32>
    %24 = arith.truncf %23 : vector<32x128xf32> to vector<32x128xbf16>
    %c0_10 = arith.constant 0 : index
    %c0_11 = arith.constant 0 : index
    %25 = vector.load %arg4[%c0_10, %c0_11] : memref<128x128xbf16, #tpu.memory_space<vmem>>, vector<128x128xbf16>
    %cst_12 = arith.constant dense<0.000000e+00> : vector<32x128xf32>
    %26 = tpu.matmul %24, %25, %cst_12 {dimension_numbers = #tpu.dot_dimension_numbers<[1], [0], [0], [1], [0, 0, 1, 1], [], []>} : vector<32x128xbf16>, vector<128x128xbf16>, vector<32x128xf32> -> vector<32x128xf32>
    %c0_13 = arith.constant 0 : index
    %c0_14 = arith.constant 0 : index
    %27 = vector.load %arg5[%c0_13, %c0_14] : memref<1x128xf32, #tpu.memory_space<vmem>>, vector<1x128xf32>
    %28 = vector.broadcast %27 : vector<1x128xf32> to vector<32x128xf32>
    %29 = arith.addf %26, %28 : vector<32x128xf32>
    %30 = arith.truncf %29 : vector<32x128xf32> to vector<32x128xbf16>
    %c0_15 = arith.constant 0 : index
    %c0_16 = arith.constant 0 : index
    %31 = vector.load %arg6[%c0_15, %c0_16] : memref<128x128xbf16, #tpu.memory_space<vmem>>, vector<128x128xbf16>
    %cst_17 = arith.constant dense<0.000000e+00> : vector<32x128xf32>
    %32 = tpu.matmul %24, %31, %cst_17 {dimension_numbers = #tpu.dot_dimension_numbers<[1], [0], [0], [1], [0, 0, 1, 1], [], []>} : vector<32x128xbf16>, vector<128x128xbf16>, vector<32x128xf32> -> vector<32x128xf32>
    %c0_18 = arith.constant 0 : index
    %c0_19 = arith.constant 0 : index
    %33 = vector.load %arg7[%c0_18, %c0_19] : memref<1x128xf32, #tpu.memory_space<vmem>>, vector<1x128xf32>
    %34 = vector.broadcast %33 : vector<1x128xf32> to vector<32x128xf32>
    %35 = arith.addf %32, %34 : vector<32x128xf32>
    %36 = arith.truncf %35 : vector<32x128xf32> to vector<32x128xbf16>
    %c0_20 = arith.constant 0 : index
    %c0_21 = arith.constant 0 : index
    %37 = vector.load %arg8[%c0_20, %c0_21] : memref<128x128xbf16, #tpu.memory_space<vmem>>, vector<128x128xbf16>
    %cst_22 = arith.constant dense<0.000000e+00> : vector<32x128xf32>
    %38 = tpu.matmul %24, %37, %cst_22 {dimension_numbers = #tpu.dot_dimension_numbers<[1], [0], [0], [1], [0, 0, 1, 1], [], []>} : vector<32x128xbf16>, vector<128x128xbf16>, vector<32x128xf32> -> vector<32x128xf32>
    %c0_23 = arith.constant 0 : index
    %c0_24 = arith.constant 0 : index
    %39 = vector.load %arg9[%c0_23, %c0_24] : memref<1x128xf32, #tpu.memory_space<vmem>>, vector<1x128xf32>
    %40 = vector.broadcast %39 : vector<1x128xf32> to vector<32x128xf32>
    %41 = arith.addf %38, %40 : vector<32x128xf32>
    %42 = arith.truncf %41 : vector<32x128xf32> to vector<32x128xbf16>
    %43 = vector.extract_strided_slice %30 {offsets = [0, 0], sizes = [16, 128], strides = [1, 1]} : vector<32x128xbf16> to vector<16x128xbf16>
    %44 = vector.extract_strided_slice %36 {offsets = [0, 0], sizes = [16, 128], strides = [1, 1]} : vector<32x128xbf16> to vector<16x128xbf16>
    %45 = vector.extract_strided_slice %42 {offsets = [0, 0], sizes = [16, 128], strides = [1, 1]} : vector<32x128xbf16> to vector<16x128xbf16>
    %cst_25 = arith.constant dense<0.000000e+00> : vector<16x16xf32>
    %46 = tpu.matmul %43, %44, %cst_25 {dimension_numbers = #tpu.dot_dimension_numbers<[1], [1], [0], [0], [0, 0, 1, 0], [], []>} : vector<16x128xbf16>, vector<16x128xbf16>, vector<16x16xf32> -> vector<16x16xf32>
    %cst_26 = arith.constant 0.0883883461 : f32
    %47 = vector.broadcast %cst_26 : f32 to vector<16x16xf32>
    %48 = arith.mulf %46, %47 : vector<16x16xf32>
    %cst_27 = arith.constant dense<0xFF800000> : vector<16xf32>
    %49 = vector.multi_reduction <maximumf>, %48, %cst_27 [1] : vector<16x16xf32> to vector<16xf32>
    %50 = vector.shape_cast %49 : vector<16xf32> to vector<16x1xf32>
    %51 = vector.broadcast %50 : vector<16x1xf32> to vector<16x16xf32>
    %52 = arith.subf %48, %51 : vector<16x16xf32>
    %53 = math.exp %52 : vector<16x16xf32>
    %cst_28 = arith.constant dense<0.000000e+00> : vector<16xf32>
    %54 = vector.multi_reduction <add>, %53, %cst_28 [1] : vector<16x16xf32> to vector<16xf32>
    %55 = vector.shape_cast %54 : vector<16xf32> to vector<16x1xf32>
    %56 = tpu.reciprocal %55 {approx = true} : vector<16x1xf32> -> vector<16x1xf32>
    %57 = vector.broadcast %56 : vector<16x1xf32> to vector<16x16xf32>
    %58 = arith.mulf %53, %57 : vector<16x16xf32>
    %59 = arith.truncf %58 : vector<16x16xf32> to vector<16x16xbf16>
    %cst_29 = arith.constant dense<0.000000e+00> : vector<16x128xf32>
    %60 = tpu.matmul %59, %45, %cst_29 {dimension_numbers = #tpu.dot_dimension_numbers<[1], [0], [0], [1], [0, 0, 1, 1], [], []>} : vector<16x16xbf16>, vector<16x128xbf16>, vector<16x128xf32> -> vector<16x128xf32>
    %c0_30 = arith.constant 0 : index
    %c0_31 = arith.constant 0 : index
    %61 = vector.load %arg19[%c0_30, %c0_31] : memref<32x128xf32, #tpu.memory_space<vmem>>, vector<16x128xf32>
    tpu.vector_store %arg19[%c0_30, %c0_31], %60 {strides = array<i32>} : memref<32x128xf32, #tpu.memory_space<vmem>>, vector<16x128xf32>,
    %62 = vector.extract_strided_slice %30 {offsets = [16, 0], sizes = [16, 128], strides = [1, 1]} : vector<32x128xbf16> to vector<16x128xbf16>
    %63 = vector.extract_strided_slice %36 {offsets = [16, 0], sizes = [16, 128], strides = [1, 1]} : vector<32x128xbf16> to vector<16x128xbf16>
    %64 = vector.extract_strided_slice %42 {offsets = [16, 0], sizes = [16, 128], strides = [1, 1]} : vector<32x128xbf16> to vector<16x128xbf16>
    %cst_32 = arith.constant dense<0.000000e+00> : vector<16x16xf32>
    %65 = tpu.matmul %62, %63, %cst_32 {dimension_numbers = #tpu.dot_dimension_numbers<[1], [1], [0], [0], [0, 0, 1, 0], [], []>} : vector<16x128xbf16>, vector<16x128xbf16>, vector<16x16xf32> -> vector<16x16xf32>
    %cst_33 = arith.constant 0.0883883461 : f32
    %66 = vector.broadcast %cst_33 : f32 to vector<16x16xf32>
    %67 = arith.mulf %65, %66 : vector<16x16xf32>
    %cst_34 = arith.constant dense<0xFF800000> : vector<16xf32>
    %68 = vector.multi_reduction <maximumf>, %67, %cst_34 [1] : vector<16x16xf32> to vector<16xf32>
    %69 = vector.shape_cast %68 : vector<16xf32> to vector<16x1xf32>
    %70 = vector.broadcast %69 : vector<16x1xf32> to vector<16x16xf32>
    %71 = arith.subf %67, %70 : vector<16x16xf32>
    %72 = math.exp %71 : vector<16x16xf32>
    %cst_35 = arith.constant dense<0.000000e+00> : vector<16xf32>
    %73 = vector.multi_reduction <add>, %72, %cst_35 [1] : vector<16x16xf32> to vector<16xf32>
    %74 = vector.shape_cast %73 : vector<16xf32> to vector<16x1xf32>
    %75 = tpu.reciprocal %74 {approx = true} : vector<16x1xf32> -> vector<16x1xf32>
    %76 = vector.broadcast %75 : vector<16x1xf32> to vector<16x16xf32>
    %77 = arith.mulf %72, %76 : vector<16x16xf32>
    %78 = arith.truncf %77 : vector<16x16xf32> to vector<16x16xbf16>
    %cst_36 = arith.constant dense<0.000000e+00> : vector<16x128xf32>
    %79 = tpu.matmul %78, %64, %cst_36 {dimension_numbers = #tpu.dot_dimension_numbers<[1], [0], [0], [1], [0, 0, 1, 1], [], []>} : vector<16x16xbf16>, vector<16x128xbf16>, vector<16x128xf32> -> vector<16x128xf32>
    %c16 = arith.constant 16 : index
    %c0_37 = arith.constant 0 : index
    %80 = vector.load %arg19[%c16, %c0_37] : memref<32x128xf32, #tpu.memory_space<vmem>>, vector<16x128xf32>
    tpu.vector_store %arg19[%c16, %c0_37], %79 {strides = array<i32>} : memref<32x128xf32, #tpu.memory_space<vmem>>, vector<16x128xf32>,
    %c0_38 = arith.constant 0 : index
    %c0_39 = arith.constant 0 : index
    %81 = vector.load %arg19[%c0_38, %c0_39] : memref<32x128xf32, #tpu.memory_space<vmem>>, vector<32x128xf32>
    %82 = arith.truncf %81 : vector<32x128xf32> to vector<32x128xbf16>
    %c0_40 = arith.constant 0 : index
    %c0_41 = arith.constant 0 : index
    %83 = vector.load %arg10[%c0_40, %c0_41] : memref<128x128xbf16, #tpu.memory_space<vmem>>, vector<128x128xbf16>
    %cst_42 = arith.constant dense<0.000000e+00> : vector<32x128xf32>
    %84 = tpu.matmul %82, %83, %cst_42 {dimension_numbers = #tpu.dot_dimension_numbers<[1], [0], [0], [1], [0, 0, 1, 1], [], []>} : vector<32x128xbf16>, vector<128x128xbf16>, vector<32x128xf32> -> vector<32x128xf32>
    %c0_43 = arith.constant 0 : index
    %c0_44 = arith.constant 0 : index
    %85 = vector.load %arg11[%c0_43, %c0_44] : memref<1x128xf32, #tpu.memory_space<vmem>>, vector<1x128xf32>
    %86 = vector.broadcast %85 : vector<1x128xf32> to vector<32x128xf32>
    %87 = arith.addf %84, %86 : vector<32x128xf32>
    %88 = arith.addf %1, %87 : vector<32x128xf32>
    %c0_45 = arith.constant 0 : index
    %c0_46 = arith.constant 0 : index
    %89 = vector.load %arg12[%c0_45, %c0_46] : memref<1x128xf32, #tpu.memory_space<vmem>>, vector<1x128xf32>
    %c0_47 = arith.constant 0 : index
    %c0_48 = arith.constant 0 : index
    %90 = vector.load %arg13[%c0_47, %c0_48] : memref<1x128xf32, #tpu.memory_space<vmem>>, vector<1x128xf32>
    %cst_49 = arith.constant dense<0.000000e+00> : vector<32xf32>
    %91 = vector.multi_reduction <add>, %88, %cst_49 [1] : vector<32x128xf32> to vector<32xf32>
    %92 = vector.shape_cast %91 : vector<32xf32> to vector<32x1xf32>
    %cst_50 = arith.constant 1.280000e+02 : f32
    %93 = vector.broadcast %cst_50 : f32 to vector<32x1xf32>
    %94 = arith.divf %92, %93 : vector<32x1xf32>
    %95 = vector.broadcast %94 : vector<32x1xf32> to vector<32x128xf32>
    %96 = arith.subf %88, %95 : vector<32x128xf32>
    %97 = arith.mulf %96, %96 : vector<32x128xf32>
    %cst_51 = arith.constant dense<0.000000e+00> : vector<32xf32>
    %98 = vector.multi_reduction <add>, %97, %cst_51 [1] : vector<32x128xf32> to vector<32xf32>
    %99 = vector.shape_cast %98 : vector<32xf32> to vector<32x1xf32>
    %cst_52 = arith.constant 1.280000e+02 : f32
    %100 = vector.broadcast %cst_52 : f32 to vector<32x1xf32>
    %101 = arith.divf %99, %100 : vector<32x1xf32>
    %cst_53 = arith.constant 9.99999974E-6 : f32
    %102 = vector.broadcast %cst_53 : f32 to vector<32x1xf32>
    %103 = arith.addf %101, %102 : vector<32x1xf32>
    %104 = math.rsqrt %103 : vector<32x1xf32>
    %105 = vector.broadcast %104 : vector<32x1xf32> to vector<32x128xf32>
    %106 = arith.mulf %96, %105 : vector<32x128xf32>
    %107 = vector.broadcast %89 : vector<1x128xf32> to vector<32x128xf32>
    %108 = arith.mulf %106, %107 : vector<32x128xf32>
    %109 = vector.broadcast %90 : vector<1x128xf32> to vector<32x128xf32>
    %110 = arith.addf %108, %109 : vector<32x128xf32>
    %111 = arith.truncf %110 : vector<32x128xf32> to vector<32x128xbf16>
    %c0_54 = arith.constant 0 : index
    %c0_55 = arith.constant 0 : index
    %112 = vector.load %arg14[%c0_54, %c0_55] : memref<128x512xbf16, #tpu.memory_space<vmem>>, vector<128x512xbf16>
    %cst_56 = arith.constant dense<0.000000e+00> : vector<32x512xf32>
    %113 = tpu.matmul %111, %112, %cst_56 {dimension_numbers = #tpu.dot_dimension_numbers<[1], [0], [0], [1], [0, 0, 1, 1], [], []>} : vector<32x128xbf16>, vector<128x512xbf16>, vector<32x512xf32> -> vector<32x512xf32>
    %c0_57 = arith.constant 0 : index
    %c0_58 = arith.constant 0 : index
    %114 = vector.load %arg15[%c0_57, %c0_58] : memref<1x512xf32, #tpu.memory_space<vmem>>, vector<1x512xf32>
    %115 = vector.broadcast %114 : vector<1x512xf32> to vector<32x512xf32>
    %116 = arith.addf %113, %115 : vector<32x512xf32>
    %cst_59 = arith.constant 5.000000e-01 : f32
    %117 = vector.broadcast %cst_59 : f32 to vector<32x512xf32>
    %118 = arith.mulf %117, %116 : vector<32x512xf32>
    %cst_60 = arith.constant 4.471500e-02 : f32
    %119 = vector.broadcast %cst_60 : f32 to vector<32x512xf32>
    %120 = arith.mulf %119, %116 : vector<32x512xf32>
    %121 = arith.mulf %120, %116 : vector<32x512xf32>
    %122 = arith.mulf %121, %116 : vector<32x512xf32>
    %123 = arith.addf %116, %122 : vector<32x512xf32>
    %cst_61 = arith.constant 0.797884583 : f32
    %124 = vector.broadcast %cst_61 : f32 to vector<32x512xf32>
    %125 = arith.mulf %124, %123 : vector<32x512xf32>
    %126 = math.tanh %125 : vector<32x512xf32>
    %cst_62 = arith.constant 1.000000e+00 : f32
    %127 = vector.broadcast %cst_62 : f32 to vector<32x512xf32>
    %128 = arith.addf %127, %126 : vector<32x512xf32>
    %129 = arith.mulf %118, %128 : vector<32x512xf32>
    %130 = arith.truncf %129 : vector<32x512xf32> to vector<32x512xbf16>
    %c0_63 = arith.constant 0 : index
    %c0_64 = arith.constant 0 : index
    %131 = vector.load %arg16[%c0_63, %c0_64] : memref<512x128xbf16, #tpu.memory_space<vmem>>, vector<512x128xbf16>
    %cst_65 = arith.constant dense<0.000000e+00> : vector<32x128xf32>
    %132 = tpu.matmul %130, %131, %cst_65 {dimension_numbers = #tpu.dot_dimension_numbers<[1], [0], [0], [1], [0, 0, 1, 1], [], []>} : vector<32x512xbf16>, vector<512x128xbf16>, vector<32x128xf32> -> vector<32x128xf32>
    %c0_66 = arith.constant 0 : index
    %c0_67 = arith.constant 0 : index
    %133 = vector.load %arg17[%c0_66, %c0_67] : memref<1x128xf32, #tpu.memory_space<vmem>>, vector<1x128xf32>
    %134 = vector.broadcast %133 : vector<1x128xf32> to vector<32x128xf32>
    %135 = arith.addf %132, %134 : vector<32x128xf32>
    %136 = arith.addf %88, %135 : vector<32x128xf32>
    %137 = vector.shape_cast %136 : vector<32x128xf32> to vector<2x16x128xf32>
    %c0_68 = arith.constant 0 : index
    %c0_69 = arith.constant 0 : index
    %c0_70 = arith.constant 0 : index
    %138 = vector.load %arg18[%c0_68, %c0_69, %c0_70] : memref<2x16x128xf32, #tpu.memory_space<vmem>>, vector<2x16x128xf32>
    tpu.vector_store %arg18[%c0_68, %c0_69, %c0_70], %137 {strides = array<i32>} : memref<2x16x128xf32, #tpu.memory_space<vmem>>, vector<2x16x128xf32>,
    return
  }
  func.func @transform_0(%arg0: i32) -> (i32, i32, i32) {
    %c0_i32 = arith.constant 0 : i32
    %c0_i32_0 = arith.constant 0 : i32
    %c0_i32_1 = arith.constant 0 : i32
    return %arg0, %c0_i32, %c0_i32_0 : i32, i32, i32
  }
  func.func @transform_1(%arg0: i32) -> (i32, i32) {
    %c0_i32 = arith.constant 0 : i32
    %c0_i32_0 = arith.constant 0 : i32
    %c0_i32_1 = arith.constant 0 : i32
    return %c0_i32, %c0_i32_0 : i32, i32
  }
  func.func @transform_2(%arg0: i32) -> (i32, i32) {
    %c0_i32 = arith.constant 0 : i32
    %c0_i32_0 = arith.constant 0 : i32
    %c0_i32_1 = arith.constant 0 : i32
    return %c0_i32, %c0_i32_0 : i32, i32
  }
  func.func @transform_3(%arg0: i32) -> (i32, i32) {
    %c0_i32 = arith.constant 0 : i32
    %c0_i32_0 = arith.constant 0 : i32
    %c0_i32_1 = arith.constant 0 : i32
    return %c0_i32, %c0_i32_0 : i32, i32
  }
  func.func @transform_4(%arg0: i32) -> (i32, i32) {
    %c0_i32 = arith.constant 0 : i32
    %c0_i32_0 = arith.constant 0 : i32
    %c0_i32_1 = arith.constant 0 : i32
    return %c0_i32, %c0_i32_0 : i32, i32
  }
  func.func @transform_5(%arg0: i32) -> (i32, i32) {
    %c0_i32 = arith.constant 0 : i32
    %c0_i32_0 = arith.constant 0 : i32
    %c0_i32_1 = arith.constant 0 : i32
    return %c0_i32, %c0_i32_0 : i32, i32
  }
  func.func @transform_6(%arg0: i32) -> (i32, i32) {
    %c0_i32 = arith.constant 0 : i32
    %c0_i32_0 = arith.constant 0 : i32
    %c0_i32_1 = arith.constant 0 : i32
    return %c0_i32, %c0_i32_0 : i32, i32
  }
  func.func @transform_7(%arg0: i32) -> (i32, i32) {
    %c0_i32 = arith.constant 0 : i32
    %c0_i32_0 = arith.constant 0 : i32
    %c0_i32_1 = arith.constant 0 : i32
    return %c0_i32, %c0_i32_0 : i32, i32
  }
  func.func @transform_8(%arg0: i32) -> (i32, i32) {
    %c0_i32 = arith.constant 0 : i32
    %c0_i32_0 = arith.constant 0 : i32
    %c0_i32_1 = arith.constant 0 : i32
    return %c0_i32, %c0_i32_0 : i32, i32
  }
  func.func @transform_9(%arg0: i32) -> (i32, i32) {
    %c0_i32 = arith.constant 0 : i32
    %c0_i32_0 = arith.constant 0 : i32
    %c0_i32_1 = arith.constant 0 : i32
    return %c0_i32, %c0_i32_0 : i32, i32
  }
  func.func @transform_10(%arg0: i32) -> (i32, i32) {
    %c0_i32 = arith.constant 0 : i32
    %c0_i32_0 = arith.constant 0 : i32
    %c0_i32_1 = arith.constant 0 : i32
    return %c0_i32, %c0_i32_0 : i32, i32
  }
  func.func @transform_11(%arg0: i32) -> (i32, i32) {
    %c0_i32 = arith.constant 0 : i32
    %c0_i32_0 = arith.constant 0 : i32
    %c0_i32_1 = arith.constant 0 : i32
    return %c0_i32, %c0_i32_0 : i32, i32
  }
  func.func @transform_12(%arg0: i32) -> (i32, i32) {
    %c0_i32 = arith.constant 0 : i32
    %c0_i32_0 = arith.constant 0 : i32
    %c0_i32_1 = arith.constant 0 : i32
    return %c0_i32, %c0_i32_0 : i32, i32
  }
  func.func @transform_13(%arg0: i32) -> (i32, i32) {
    %c0_i32 = arith.constant 0 : i32
    %c0_i32_0 = arith.constant 0 : i32
    %c0_i32_1 = arith.constant 0 : i32
    return %c0_i32, %c0_i32_0 : i32, i32
  }
  func.func @transform_14(%arg0: i32) -> (i32, i32) {
    %c0_i32 = arith.constant 0 : i32
    %c0_i32_0 = arith.constant 0 : i32
    %c0_i32_1 = arith.constant 0 : i32
    return %c0_i32, %c0_i32_0 : i32, i32
  }
  func.func @transform_15(%arg0: i32) -> (i32, i32) {
    %c0_i32 = arith.constant 0 : i32
    %c0_i32_0 = arith.constant 0 : i32
    %c0_i32_1 = arith.constant 0 : i32
    return %c0_i32, %c0_i32_0 : i32, i32
  }
  func.func @transform_16(%arg0: i32) -> (i32, i32) {
    %c0_i32 = arith.constant 0 : i32
    %c0_i32_0 = arith.constant 0 : i32
    %c0_i32_1 = arith.constant 0 : i32
    return %c0_i32, %c0_i32_0 : i32, i32
  }
  func.func @transform_17(%arg0: i32) -> (i32, i32, i32) {
    %c0_i32 = arith.constant 0 : i32
    %c0_i32_0 = arith.constant 0 : i32
    %c0_i32_1 = arith.constant 0 : i32
    return %arg0, %c0_i32, %c0_i32_0 : i32, i32, i32
  }
}

</mosaic_0001>

<bundles_post_ra>
// kernel: tpu_custom_call.1
= control target key start
LH: loop header
LB: loop body
LE: loop exit
PB: predicated region body
PF: predicated region fallthrough
CT: control target
= control target key end

     0   :  { %s4232_s0 = inlined_call_operand.hbm [shape: f32[4,16,128], index: 0, kind: input, shape index: {}]   ;;  %s4233_s1 = inlined_call_operand.vmem [shape: f32[1,128], index: 1, kind: input, shape index: {}]   ;;  %s4234_s2 = inlined_call_operand.vmem [shape: f32[1,128], index: 2, kind: input, shape index: {}]   ;;  %s4235_s3 = inlined_call_operand.hbm [shape: bf16[128,128], index: 3, kind: input, shape index: {}]   ;;  %s4236_s4 = inlined_call_operand.vmem [shape: f32[1,128], index: 4, kind: input, shape index: {}]   ;;  %s4237_s5 = inlined_call_operand.hbm [shape: bf16[128,128], index: 5, kind: input, shape index: {}]   ;;  %s4238_s6 = inlined_call_operand.vmem [shape: f32[1,128], index: 6, kind: input, shape index: {}]   ;;  %s4239_s7 = inlined_call_operand.hbm [shape: bf16[128,128], index: 7, kind: input, shape index: {}]   ;;  %s4240_s8 = inlined_call_operand.vmem [shape: f32[1,128], index: 8, kind: input, shape index: {}]   ;;  %s4241_s9 = inlined_call_operand.hbm [shape: bf16[128,128], index: 9, kind: input, shape index: {}]   ;;  %s4242_s10 = inlined_call_operand.vmem [shape: f32[1,128], index: 10, kind: input, shape index: {}]   ;;  %s4243_s11 = inlined_call_operand.vmem [shape: f32[1,128], index: 11, kind: input, shape index: {}]   ;;  %s4244_s12 = inlined_call_operand.vmem [shape: f32[1,128], index: 12, kind: input, shape index: {}]   ;;  %s4245_s13 = inlined_call_operand.hbm [shape: bf16[128,512], index: 13, kind: input, shape index: {}]   ;;  %s4246_s14 = inlined_call_operand.vmem [shape: f32[1,512], index: 14, kind: input, shape index: {}]   ;;  %s4247_s15 = inlined_call_operand.hbm [shape: bf16[512,128], index: 15, kind: input, shape index: {}]   ;;  %s4248_s16 = inlined_call_operand.vmem [shape: f32[1,128], index: 16, kind: input, shape index: {}]   ;;  %s4249_s17 = inlined_call_operand.hbm [shape: f32[4,16,128], index: 17, kind: output, shape index: {}]  }
   0x1   :  { %4259 = sst [smem:[#allocation21_spill]] %s4232_s0 }
   0x2   :  { %4260 = sst [smem:[#allocation22_spill]] %s4233_s1 }
   0x3   :  { %4261 = sst [smem:[#allocation23_spill]] %s4235_s3 }
   0x4   :  { %4262 = sst [smem:[#allocation24_spill]] %s4239_s7 }
   0x5   :  { %4263 = sst [smem:[#allocation25_spill]] %s4240_s8 }
   0x6   :  { %4264 = sst [smem:[#allocation26_spill]] %s4242_s10 }
   0x7   :  { %4265 = sst [smem:[#allocation27_spill]] %s4243_s11 }
   0x8   :  { %4266 = sst [smem:[#allocation28_spill]] %s4244_s12 }
   0x9   :  { %4267 = sst [smem:[#allocation29_spill]] %s4246_s14 }
   0xa   :  { %4268 = sst [smem:[#allocation30_spill]] %s4248_s16 }
   0xb   :  { %4269 = sst [smem:[#allocation31_spill]] %s4249_s17 }
   0xc   :  { %22 = vsyncpa [#allocation4], 0 }
   0xd   :  { %24 = vsyncpa [#allocation4 + $0x1], 0 }
   0xe   :  { %25 = vsyncpa [#allocation7], 0 }
   0xf   :  { %26 = vsyncpa [#allocation10], 0 }
  0x10   :  { %27 = vsyncpa [#allocation13], 0 }
  0x11   :  { %28 = vsyncpa [#allocation5], 0 }
  0x12   :  { %30 = vsyncpa [#allocation5 + $0x1], 0  ;;  %s3550_s24 = smov 0   ;;  %s3552_s25 = smov 0  }
  0x13   :  { %s3554_s26 = smov 0   ;;  %s3556_s27 = smov 0  }
  0x14 LB: > { %s3441_s28 = smov [#allocation6]   ;;  %s3571_s0 = sadd.s32 4294967295, %s3439_s27   ;;  %s3439_s27 = sphi %s3556_s27, %s4305_s27   ;;  %s3435_s26 = sphi %s3554_s26, %s4304_s26   ;;  %s3431_s25 = sphi %s3552_s25, %s4303_s25   ;;  %s3427_s24 = sphi %s3550_s24, %s4302_s24  }
  0x15   : > { %s447_s29 = sshll.u32 %s3441_s28, 4  ;;  %p2507_p0 = scmp.ge.s32.totalorder %s3439_s27, 1  ;;  %s3576_s29 = int_to_ptr.vmem [resolvable:$true] %s447_s29 }
  0x16   : > { %p4256_p1 = scmp.eq.s32.totalorder %s3571_s0, 0  ;;  %p429_p2 = scmp.lt.s32.totalorder %s3439_s27, 3 }
  0x17   : > { %s3442_s18 = smov [#allocation9]   ;;  %s3443_s20 = smov [#allocation12]  }
  0x18   : > { %p3578_p3 = pnand %p2507_p0, %p429_p2  ;;  %s479_s19 = sshll.u32 %s3442_s18, 4  ;;  %s3591_s19 = int_to_ptr.vmem [resolvable:$true] %s479_s19 }
  0x19   : > { %s517_s21 = sshll.u32 %s3443_s20, 4  ;;  %s4272_s3 = sld [smem:[#allocation23_spill]]  ;;  %s3593_s21 = int_to_ptr.vmem [resolvable:$true] %s517_s21 }
  0x1a   : > { %s4270_s30 = scalar_select %p3578_p3, 1, 0 }
  0x1b   : > { %p2897_p5 = pneg %p3578_p3 }
  0x1d   : > { %p3587_p6 = pnand %p2897_p5, %p4256_p1 }
  0x1f   : > { %s3163_s28 = scalar_lea.hbm %s4272_s3, 1024  ;;  %p3603_p8 = pneg %p3587_p6 }
  0x20   : > { %p3164_p7 = scmp.ne.s32.totalorder %s4272_s3, %s3163_s28  ;;  %p3170_p11 = scmp.lt.u32.totalorder %s3163_s28, %s4272_s3 }
  0x22   : > { %p3166_p9 = pnand %p3603_p8, %p3164_p7 }
  0x24   : > { %p3167_p10 = pneg %p3166_p9 }
  0x26   : > { %p3172_p12 = pnand %p3170_p11, %p3167_p10 }
  0x28   : > { %3175 = shalt.err (!%p3172_p12)
}
  0x29   : > { %s3176_s16 = scalar_lea.vmem %s3576_s29, 1024  ;;  %p3184_p5 = scmp.lt.s32.totalorder %s3576_s29, %s3576_s29 }
  0x2a   : > { %p3177_p13 = scmp.ne.s32.totalorder %s3576_s29, %s3176_s16  ;;  %p3185_p4 = scmp.lt.s32.totalorder %s3176_s16, %s3176_s16 }
  0x2c   : > { %p3179_p0 = pnand %p3177_p13, %p3603_p8  ;;  %p3186_p7 = por %p3185_p4, %p3184_p5 }
  0x2e   : > { %p3180_p2 = pneg %p3179_p0 }
  0x30   : > { %p3187_p9 = pnand %p3186_p7, %p3180_p2 }
  0x32   : > { %3190 = shalt.err (!%p3187_p9)
}
  0x33   : > { %s4252_s17 = smov 64   ;;  %s4254_s14 = smov 4  }
  0x34   : > { %2900 = dma.hbm_to_vmem [thread:$0]  (!%p3587_p6), %s4272_s3, 1024, %s3576_s29, [#allocation7], %s4252_s17, %s4252_s17, %s4254_s14  }
  0x35   : > { %s4274_s7 = sld [smem:[#allocation24_spill]] }
  0x3b   : > { %s3191_s16 = scalar_lea.hbm %s4274_s7, 1024 }
  0x3c   : > { %p3192_p4 = scmp.ne.s32.totalorder %s4274_s7, %s3191_s16  ;;  %p3198_p12 = scmp.lt.u32.totalorder %s3191_s16, %s4274_s7 }
  0x3e   : > { %p3194_p10 = pnand %p3192_p4, %p3603_p8 }
  0x40   : > { %p3195_p11 = pneg %p3194_p10 }
  0x42   : > { %p3200_p13 = pnand %p3198_p12, %p3195_p11 }
  0x44   : > { %3203 = shalt.err (!%p3200_p13)
}
  0x45   : > { %s3204_s29 = scalar_lea.vmem %s3591_s19, 1024  ;;  %p3212_p7 = scmp.lt.s32.totalorder %s3591_s19, %s3591_s19 }
  0x46   : > { %p3205_p0 = scmp.ne.s32.totalorder %s3591_s19, %s3204_s29  ;;  %p3213_p9 = scmp.lt.s32.totalorder %s3204_s29, %s3204_s29 }
  0x48   : > { %p3207_p2 = pnand %p3205_p0, %p3603_p8  ;;  %p3214_p4 = por %p3213_p9, %p3212_p7 }
  0x4a   : > { %p3208_p5 = pneg %p3207_p2 }
  0x4c   : > { %p3215_p10 = pnand %p3214_p4, %p3208_p5 }
  0x4e   : > { %3218 = shalt.err (!%p3215_p10)
}
  0x4f   : > { %2906 = dma.hbm_to_vmem [thread:$0]  (!%p3587_p6), %s4274_s7, 1024, %s3591_s19, [#allocation10], %s4252_s17, %s4252_s17, %s4254_s14  }
  0x50   : > { %s3219_s22 = scalar_lea.hbm %s4245_s13, 4096 }
  0x51   : > { %p3220_p11 = scmp.ne.s32.totalorder %s4245_s13, %s3219_s22  ;;  %p3226_p0 = scmp.lt.u32.totalorder %s3219_s22, %s4245_s13 }
  0x53   : > { %p3222_p12 = pnand %p3220_p11, %p3603_p8 }
  0x55   : > { %p3223_p13 = pneg %p3222_p12 }
  0x57   : > { %p3228_p2 = pnand %p3226_p0, %p3223_p13 }
  0x59   : > { %3231 = shalt.err (!%p3228_p2)
}
  0x5a   : > { %s3232_s19 = scalar_lea.vmem %s3593_s21, 4096  ;;  %p3240_p4 = scmp.lt.s32.totalorder %s3593_s21, %s3593_s21 }
  0x5b   : > { %p3233_p5 = scmp.ne.s32.totalorder %s3593_s21, %s3232_s19  ;;  %p3241_p10 = scmp.lt.s32.totalorder %s3232_s19, %s3232_s19 }
  0x5d   : > { %p3235_p7 = pnand %p3233_p5, %p3603_p8  ;;  %p3242_p11 = por %p3241_p10, %p3240_p4 }
  0x5f   : > { %p3236_p9 = pneg %p3235_p7 }
  0x61   : > { %p3243_p12 = pnand %p3242_p11, %p3236_p9 }
  0x63   : > { %3246 = shalt.err (!%p3243_p12)
}
  0x64   : > { %s3446_s29 = smov 256   ;;  %s3447_s8 = smov 16  }
  0x65   : > { %2912 = dma.hbm_to_vmem [thread:$0]  (!%p3587_p6), %s4245_s13, 4096, %s3593_s21, [#allocation13], %s3446_s29, %s3446_s29, %s3447_s8  }
  0x66   : > { %s3448_s12 = smov [#allocation8]   ;;  %s3449_s23 = smov [#allocation11]  }
  0x67   : > { %s463_s22 = sshll.u32 %s3448_s12, 4  ;;  %s495_s28 = sshll.u32 %s3449_s23, 4  ;;  %s464_s22 = int_to_ptr.vmem [resolvable:$true] %s463_s22  ;;  %s496_s28 = int_to_ptr.vmem [resolvable:$true] %s495_s28 }
  0x68   : > { %s3247_s19 = scalar_lea.hbm %s4237_s5, 1024 }
  0x69   : > { %p3248_p13 = scmp.ne.s32.totalorder %s4237_s5, %s3247_s19  ;;  %p3254_p5 = scmp.lt.u32.totalorder %s3247_s19, %s4237_s5 }
  0x6b   : > { %p3250_p0 = pnand %p3248_p13, %p3603_p8 }
  0x6d   : > { %p3251_p2 = pneg %p3250_p0 }
  0x6f   : > { %p3256_p7 = pnand %p3254_p5, %p3251_p2 }
  0x71   : > { %3259 = shalt.err (!%p3256_p7)
}
  0x72   : > { %s3260_s21 = scalar_lea.vmem %s464_s22, 1024  ;;  %p3268_p11 = scmp.lt.s32.totalorder %s464_s22, %s464_s22 }
  0x73   : > { %p3261_p9 = scmp.ne.s32.totalorder %s464_s22, %s3260_s21  ;;  %p3269_p12 = scmp.lt.s32.totalorder %s3260_s21, %s3260_s21 }
  0x75   : > { %p3263_p4 = pnand %p3261_p9, %p3603_p8  ;;  %p3270_p1 = por %p3269_p12, %p3268_p11 }
  0x77   : > { %p3264_p10 = pneg %p3263_p4 }
  0x79   : > { %p3271_p3 = pnand %p3270_p1, %p3264_p10 }
  0x7b   : > { %3274 = shalt.err (!%p3271_p3)
}
  0x7c   : > { %s4275_s17 = smov 4   ;;  %s4276_s14 = smov 64  }
  0x7d   : > { %2903 = dma.hbm_to_vmem [thread:$0]  (!%p3587_p6), %s4237_s5, 1024, %s464_s22, [#allocation7], %s4276_s14, %s4276_s14, %s4275_s17  }
  0x7e   : > { %s3275_s10 = scalar_lea.hbm %s4241_s9, 1024 }
  0x7f   : > { %p3276_p1 = scmp.ne.s32.totalorder %s4241_s9, %s3275_s10  ;;  %p3282_p0 = scmp.lt.u32.totalorder %s3275_s10, %s4241_s9 }
  0x81   : > { %p3278_p3 = pnand %p3276_p1, %p3603_p8 }
  0x83   : > { %p3279_p13 = pneg %p3278_p3 }
  0x85   : > { %p3284_p2 = pnand %p3282_p0, %p3279_p13 }
  0x87   : > { %3287 = shalt.err (!%p3284_p2)
}
  0x88   : > { %s3288_s16 = scalar_lea.vmem %s496_s28, 1024  ;;  %p3296_p4 = scmp.lt.s32.totalorder %s496_s28, %s496_s28 }
  0x89   : > { %p3289_p5 = scmp.ne.s32.totalorder %s496_s28, %s3288_s16  ;;  %p3297_p10 = scmp.lt.s32.totalorder %s3288_s16, %s3288_s16 }
  0x8b   : > { %p3291_p7 = pnand %p3289_p5, %p3603_p8  ;;  %p3298_p11 = por %p3297_p10, %p3296_p4 }
  0x8d   : > { %p3292_p9 = pneg %p3291_p7 }
  0x8f   : > { %p3299_p12 = pnand %p3298_p11, %p3292_p9 }
  0x91   : > { %3302 = shalt.err (!%p3299_p12)
}
  0x92   : > { %2909 = dma.hbm_to_vmem [thread:$0]  (!%p3587_p6), %s4241_s9, 1024, %s496_s28, [#allocation10], %s4276_s14, %s4276_s14, %s4275_s17  }
  0x93   : > { %s3450_s21 = smov [#allocation14]   ;;  %s3303_s8 = scalar_lea.hbm %s4247_s15, 4096 }
  0x94   : > { %s533_s3 = sshll.u32 %s3450_s21, 4  ;;  %p3304_p1 = scmp.ne.s32.totalorder %s4247_s15, %s3303_s8  ;;  %s534_s3 = int_to_ptr.vmem [resolvable:$true] %s533_s3 }
  0x95   : > { %p3310_p0 = scmp.lt.u32.totalorder %s3303_s8, %s4247_s15 }
  0x96   : > { %p3306_p3 = pnand %p3304_p1, %p3603_p8 }
  0x98   : > { %p3307_p13 = pneg %p3306_p3 }
  0x9a   : > { %p3312_p2 = pnand %p3310_p0, %p3307_p13 }
  0x9c   : > { %3315 = shalt.err (!%p3312_p2)
}
  0x9d   : > { %s3316_s28 = scalar_lea.vmem %s534_s3, 4096  ;;  %p3324_p4 = scmp.lt.s32.totalorder %s534_s3, %s534_s3 }
  0x9e   : > { %p3317_p5 = scmp.ne.s32.totalorder %s534_s3, %s3316_s28  ;;  %p3325_p10 = scmp.lt.s32.totalorder %s3316_s28, %s3316_s28 }
  0xa0   : > { %p3319_p7 = pnand %p3317_p5, %p3603_p8  ;;  %p3326_p11 = por %p3325_p10, %p3324_p4 }
  0xa2   : > { %p3320_p9 = pneg %p3319_p7 }
  0xa4   : > { %p3327_p12 = pnand %p3326_p11, %p3320_p9 }
  0xa6   : > { %3330 = shalt.err (!%p3327_p12)
}
  0xa7   : > { %2915 = dma.hbm_to_vmem [thread:$0]  (!%p3587_p6), %s4247_s15, 4096, %s534_s3, [#allocation13], %s4276_s14, %s4276_s14, %s4275_s17  }
  0xa8   : > { %s2506_s1 = sadd.s32 4294967294, %s3439_s27   ;;  %s3741_s18 = sadd.s32 1, %s3439_s27  }
  0xa9   : > { %s40_s22 = ssub.s32 %s3439_s27, %s3741_s18  ;;  %s43_s19 = sadd.s32 1, %s3435_s26 }
  0xaa   : > { %p41_p8 = scmp.eq.s32.totalorder %s40_s22, 0  ;;  %p50_p1 = scmp.ne.s32.totalorder %s3435_s26, %s3431_s25 }
  0xab   : > { %p51_p3 = scmp.eq.s32.totalorder %s3439_s27, 0  ;;  %p56_p13 = scmp.ne.s32.totalorder %s3431_s25, %s3427_s24 }
  0xac   : > { %s3752_s21 = scalar_select %p41_p8, %s3435_s26, %s43_s19  }
  0xad   : > { %p3754_p0 = por %p51_p3, %p50_p1  ;;  %p4278_p2 = scmp.eq.s32.totalorder %s3571_s0, 0 }
  0xae   : > { %p416_p5 = scmp.eq.s32.totalorder %s3571_s0, 1  ;;  %p422_p7 = scmp.eq.s32.totalorder %s2506_s1, 1 }
  0xaf   : > { %p3760_p6 = por %p4278_p2, %p56_p13  ;;  %p2930_p9 = scmp.lt.s32.totalorder %s3439_s27, 2 }
  0xb0   : > { %s550_s14 = sand.u32 1, %s3435_s26   ;;  %p3767_p4 = por %p416_p5, %p50_p1 }
  0xb1   : > { %p3771_p10 = por %p422_p7, %p56_p13  ;;  %s2515_s8 = sshll.u32 %s550_s14, 5 }
  0xb2   : > { %s4280_s3 = scalar_select %p3767_p4, 1, 0 }
  0xb3   : > { %s4281_s29 = scalar_select %p3771_p10, 1, 0 }
  0xb4   : > { %s2642_s10 = sshll.u32 %s3439_s27, 9  ;;  %s4282_s23 = sld [smem:[#allocation21_spill]] }
  0xb5   : > { %s554_s20 = scalar_lea.vmem [#allocation3], %s2515_s8  ;;  %p3785_p11 = pnand %p2930_p9, %p3754_p0 }
  0xb6   : > { %s562_s16 = sshll.u32 %s554_s20, 4  ;;  %s3789_s22 = scalar_lea.sflag [#allocation4], %s550_s14  ;;  %s3781_s16 = int_to_ptr.vmem [resolvable:$true] %s562_s16 }
  0xb7   : > { %p3333_p8 = pneg %p3785_p11 }
  0xba   : > { %s3779_s28 = scalar_lea.hbm %s4282_s23, %s2642_s10  ;;  %s3336_s7 = scalar_lea.hbm %s4282_s23, 1024 }
  0xbb   : > { %s3331_s19 = scalar_lea.hbm %s3779_s28, 512  ;;  %p3337_p13 = scmp.lt.u32.totalorder %s3779_s28, %s4282_s23 }
  0xbc   : > { %p3332_p12 = scmp.ne.s32.totalorder %s3779_s28, %s3331_s19  ;;  %p3338_p0 = scmp.lt.u32.totalorder %s3336_s7, %s3331_s19 }
  0xbd   : > { %p3340_p5 = scmp.lt.u32.totalorder %s3331_s19, %s3779_s28 }
  0xbe   : > { %p3334_p1 = pnand %p3333_p8, %p3332_p12  ;;  %p3339_p2 = por %p3338_p0, %p3337_p13 }
  0xc0   : > { %p3335_p3 = pneg %p3334_p1  ;;  %p3341_p7 = por %p3340_p5, %p3339_p2 }
  0xc2   : > { %p3342_p9 = pnand %p3341_p7, %p3335_p3 }
  0xc4   : > { %3345 = shalt.err (!%p3342_p9)
}
  0xc5   : > { %s3346_s14 = scalar_lea.vmem %s3781_s16, 512  ;;  %s3451_s20 = smov [#allocation3]  }
  0xc6   : > { %p3347_p12 = scmp.ne.s32.totalorder %s3781_s16, %s3346_s14  ;;  %s3351_s8 = sshll.u32 %s3451_s20, 4  ;;  %s3352_s8 = int_to_ptr.vmem [resolvable:$false] %s3351_s8 }
  0xc7   : > { %s3353_s10 = scalar_lea.vmem %s3352_s8, 1024  ;;  %p3354_p4 = scmp.lt.s32.totalorder %s3781_s16, %s3352_s8 }
  0xc8   : > { %p3349_p1 = pnand %p3347_p12, %p3333_p8  ;;  %p3355_p13 = scmp.lt.s32.totalorder %s3353_s10, %s3346_s14 }
  0xca   : > { %p3350_p10 = pneg %p3349_p1  ;;  %p3356_p0 = por %p3355_p13, %p3354_p4 }
  0xcc   : > { %p3357_p2 = pnand %p3356_p0, %p3350_p10 }
  0xce   : > { %3360 = shalt.err (!%p3357_p2)
}
  0xcf   : > { %s3452_s19 = smov 128   ;;  %s3453_s7 = smov 8  }
  0xd0   : > { %2919 = dma.hbm_to_vmem [thread:$0]  (!%p3785_p11), %s3779_s28, 512, %s3781_s16, %s3789_s22, %s3452_s19, %s3452_s19, %s3453_s7  }
  0xd1   : > { %p4284_p8 = scmp.ne.s32.totalorder %s4270_s30, 0 }
  0xd2   : > { %s3820_s11 = sand.u32 (!%p4284_p8), 1, %s3431_s25  }
  0xd3   : > { %574 = sbr.rel (%p4284_p8) target bundleno = 3120 (0xc30), region = 88  ;;  %s2520_s12 = sshll.u32 (!%p4284_p8), %s3820_s11, 5 }
  0xd4   : > { %s577_s14 = scalar_lea.sflag (!%p4284_p8), [#allocation4], %s3820_s11  ;;  %s580_s20 = scalar_lea.vmem (!%p4284_p8), [#allocation3], %s2520_s12 }
  0xda   : > { %3406 = dma.done.wait (%p3760_p6), %s577_s14, 512  }
  0xdb   : > { %3408 = vsyncadd (%p3760_p6), %s577_s14, 4294966784  ;;  %p4285_p4 = scmp.eq.s32.totalorder %s3571_s0, 0 }
  0xdd   : > { %3410 = dma.done.wait (%p4285_p4), [#allocation7], 2048   ;;  %p4286_p10 = pmov %p4285_p4 }
  0xde   : > { %p4287_p11 = pmov %p4285_p4 }
  0xdf   : > { %3412 = vsyncadd (%p4286_p10), [#allocation7], 4294965248 }
  0xe0   : > { %3414 = dma.done.wait (%p4287_p11), [#allocation10], 2048   ;;  %p4288_p3 = pmov %p4285_p4 }
  0xe2   : > { %3416 = vsyncadd (%p4288_p3), [#allocation10], 4294965248  ;;  %p4289_p5 = pmov %p4288_p3 }
  0xe3   : > { %p4290_p7 = pmov %p4288_p3 }
  0xe4   : > { %3418 = dma.done.wait (%p4289_p5), [#allocation13], 8192  }
  0xe5   : > { %3420 = vsyncadd (%p4290_p7), [#allocation13], 4294959104  ;;  %v3842_v0 = vld [vmem:[%s580_s20] sm:$0xff]  ;;  %v3844_v1 = vld [vmem:[%s580_s20 + $0x10] sm:$0xff]  ;;  %s4291_s28 = sld [smem:[#allocation22_spill]]  ;;  %vm3455_vm0 = vmmov 0  }
  0xe6   : > { %v3846_v2 = vld [vmem:[%s580_s20 + $0x8] sm:$0xff]  ;;  %664 = vadd.xlane.f32.xlu0 %v3842_v0  ;;  %668 = vadd.xlane.f32.xlu1 %v3844_v1  ;;  %v3850_v3 = vld [vmem:[%s580_s20 + $0x18] sm:$0xff]  ;;  %v2987_v4 = vld [vmem:[#allocation6] sm:$0xff]   ;;  %s4292_s20 = sld [smem:[#allocation25_spill]]  ;;  %vm1140_vm1 = vcmask 130048   ;;  %s4294_s22 = sld [smem:[#allocation27_spill]] }
  0xe7   : > { %v2988_v5 = vld [vmem:[#allocation8] sm:$0xff]   ;;  %2749 = vmatprep.subr.bf16.mxu0 %v2987_v4  ;;  %v2989_v22 = vld [vmem:[#allocation6 + $0x8] sm:$0xff]   ;;  %v2991_v24 = vld [vmem:[#allocation6 + $0x10] sm:$0xff]   ;;  %s4295_s19 = sld [smem:[#allocation28_spill]]  ;;  %s654_s16 = scalar_lea.vmem [#allocation15], %s2520_s12 }
  0xe8   : > { %2769 = vmatprep.subr.bf16.mxu1 %v2988_v5  ;;  %2750 = vmatpush3.bf16.msra.mxu0 %v2987_v4  ;;  %v2990_v23 = vld [vmem:[#allocation8 + $0x8] sm:$0xff]   ;;  %v2992_v25 = vld [vmem:[#allocation8 + $0x10] sm:$0xff]   ;;  %v2993_v26 = vld [vmem:[#allocation6 + $0x18] sm:$0xff]   ;;  %s2376_s1 = sshll.u32 %s654_s16, 4  ;;  %s2644_s12 = sshll.u32 %s3571_s0, 9  ;;  %s4181_s1 = int_to_ptr.vmem [resolvable:$true] %s2376_s1 }
  0xe9   : > { %2770 = vmatpush3.bf16.msra.mxu1 %v2988_v5  ;;  %2751 = vmatprep.subr.bf16.mxu0 %v2989_v22  ;;  %v2994_v27 = vld [vmem:[#allocation8 + $0x18] sm:$0xff]   ;;  %v2995_v28 = vld [vmem:[#allocation6 + $0x20] sm:$0xff]   ;;  %v2997_v30 = vld [vmem:[#allocation6 + $0x28] sm:$0xff]   ;;  %s4298_s10 = sld [smem:[#allocation31_spill]]  ;;  %s2362_s7 = scalar_lea.sflag [#allocation5], %s3820_s11 }
  0xea   : > { %666 = vadd.xlane.f32.xlu0 %v3846_v2  ;;  %670 = vadd.xlane.f32.xlu1 %v3850_v3  ;;  %v2996_v29 = vld [vmem:[#allocation8 + $0x20] sm:$0xff]   ;;  %v2998_v31 = vld [vmem:[#allocation8 + $0x28] sm:$0xff]   ;;  %v2999_v32 = vld [vmem:[#allocation6 + $0x30] sm:$0xff]   ;;  %s3361_s14 = scalar_lea.vmem %s4181_s1, 512  ;;  %p4299_p9 = scmp.ne.s32.totalorder %s4280_s3, 0 }
  0xeb   : > { %2771 = vmatprep.subr.bf16.mxu1 %v2990_v23  ;;  %v3000_v33 = vld [vmem:[#allocation8 + $0x30] sm:$0xff]   ;;  %v3001_v34 = vld [vmem:[#allocation6 + $0x38] sm:$0xff]   ;;  %v3003_v36 = vld [vmem:[#allocation9] sm:$0xff]   ;;  %p3362_p6 = scmp.ne.s32.totalorder %s4181_s1, %s3361_s14  ;;  %s3457_s0 = smov [#allocation15]  }
  0xec   : > { %2752 = vmatpush3.bf16.msra.mxu0 %v2989_v22  ;;  %v3002_v35 = vld [vmem:[#allocation8 + $0x38] sm:$0xff]   ;;  %v2528_v51 = vld [vmem:[%s4291_s28] ss:$0 sm:$0xff]  ;;  %s4293_s28 = sld [smem:[#allocation26_spill]] }
  0xed   : > { %2772 = vmatpush3.bf16.msra.mxu1 %v2990_v23  ;;  %2753 = vmatprep.subr.bf16.mxu0 %v2991_v24  ;;  %v2529_v56 = vld [vmem:[%s4234_s2] ss:$0 sm:$0xff]  ;;  %p3363_p12 = pnand %p3362_p6, %p4299_p9 }
  0xee   : > { %2773 = vmatprep.subr.bf16.mxu1 %v2992_v25 }
  0xef   : > { %p3364_p1 = pneg %p3363_p12 }
  0xf0   : > { %2754 = vmatpush3.bf16.msra.mxu0 %v2991_v24 }
  0xf1   : > { %2774 = vmatpush3.bf16.msra.mxu1 %v2992_v25  ;;  %2755 = vmatprep.subr.bf16.mxu0 %v2993_v26 }
  0xf2   : > { %2775 = vmatprep.subr.bf16.mxu1 %v2994_v27 }
  0xf4   : > { %2756 = vmatpush3.bf16.msra.mxu0 %v2993_v26 }
  0xf5   : > { %2776 = vmatpush3.bf16.msra.mxu1 %v2994_v27  ;;  %2757 = vmatprep.subr.bf16.mxu0 %v2995_v28 }
  0xf6   : > { %2777 = vmatprep.subr.bf16.mxu1 %v2996_v29 }
  0xf8   : > { %2758 = vmatpush3.bf16.msra.mxu0 %v2995_v28 }
  0xf9   : > { %2778 = vmatpush3.bf16.msra.mxu1 %v2996_v29  ;;  %2759 = vmatprep.subr.bf16.mxu0 %v2997_v30 }
  0xfa   : > { %2779 = vmatprep.subr.bf16.mxu1 %v2998_v31 }
  0xfc   : > { %2760 = vmatpush3.bf16.msra.mxu0 %v2997_v30 }
  0xfd   : > { %2780 = vmatpush3.bf16.msra.mxu1 %v2998_v31  ;;  %2761 = vmatprep.subr.bf16.mxu0 %v2999_v32 }
  0xfe   : > { %2781 = vmatprep.subr.bf16.mxu1 %v3000_v33 }
 0x100   : > { %2762 = vmatpush3.bf16.msra.mxu0 %v2999_v32 }
 0x101   : > { %2782 = vmatpush3.bf16.msra.mxu1 %v3000_v33  ;;  %2763 = vmatprep.subr.bf16.mxu0 %v3001_v34 }
 0x102   : > { %2783 = vmatprep.subr.bf16.mxu1 %v3002_v35 }
 0x104   : > { %2764 = vmatpush3.bf16.msra.mxu0 %v3001_v34 }
 0x105   : > { %2784 = vmatpush3.bf16.msra.mxu1 %v3002_v35  ;;  %2789 = vmatprep.subr.bf16.mxu0 %v3003_v36 }
 0x173   : > { %v665_v6 = vpop.xlane.xlu0 %664  ;;  %v669_v7 = vpop.xlane.xlu1 %668 }
 0x174   : > { %v673_v8 = vmul.f32 0.0078125, %v665_v6  ;;  %v675_v9 = vmul.f32 0.0078125, %v669_v7 }
 0x176   : > { %v3855_v10 = vsub.f32 %v3842_v0, %v673_v8  ;;  %v3858_v11 = vsub.f32 %v3844_v1, %v675_v9  ;;  %v3004_v9 = vld [vmem:[#allocation9 + $0x8] sm:$0xff]  }
 0x177   : > { %v667_v12 = vpop.xlane.xlu0 %666  ;;  %v671_v13 = vpop.xlane.xlu1 %670 }
 0x178   : > { %v674_v14 = vmul.f32 0.0078125, %v667_v12  ;;  %v681_v15 = vmul.f32 %v3855_v10, %v3855_v10  ;;  %v676_v16 = vmul.f32 0.0078125, %v671_v13  ;;  %v683_v19 = vmul.f32 %v3858_v11, %v3858_v11  ;;  %v3007_v12 = vld [vmem:[#allocation9 + $0x20] sm:$0xff]   ;;  %v3008_v13 = vld [vmem:[#allocation9 + $0x28] sm:$0xff]  }
 0x17a   : > { %v3863_v17 = vsub.f32 %v3846_v2, %v674_v14  ;;  %685 = vadd.xlane.f32.xlu0 %v681_v15  ;;  %v3866_v18 = vsub.f32 %v3850_v3, %v676_v16  ;;  %v3009_v14 = vld [vmem:[#allocation9 + $0x30] sm:$0xff]   ;;  %v3010_v15 = vld [vmem:[#allocation9 + $0x38] sm:$0xff]   ;;  %v3454_v16 = vmov 0.0  }
 0x17b   : > { %2809 = vmatprep.subr.bf16.mxu1 %v3454_v16 }
 0x17c   : > { %v682_v20 = vmul.f32 %v3863_v17, %v3863_v17  ;;  %v684_v21 = vmul.f32 %v3866_v18, %v3866_v18 }
 0x17e   : > { %689 = vadd.xlane.f32.xlu0 %v683_v19  ;;  %687 = vadd.xlane.f32.xlu1 %v682_v20 }
 0x182   : > { %691 = vadd.xlane.f32.xlu1 %v684_v21 }
 0x207   : > { %v686_v37 = vpop.xlane.xlu0 %685 }
 0x208   : > { %v693_v38 = vmul.f32 0.0078125, %v686_v37 }
 0x20a   : > { %v697_v39 = vadd.f32 1e-05, %v693_v38 }
 0x20b   : > { %v688_v40 = vpop.xlane.xlu1 %687  ;;  %v690_v41 = vpop.xlane.xlu0 %689 }
 0x20c   : > { %3099 = vrsqrt.f32 %v697_v39  ;;  %v694_v42 = vmul.f32 0.0078125, %v688_v40  ;;  %v695_v43 = vmul.f32 0.0078125, %v690_v41  ;;  %v2548_v39 = vld [vmem:[%s4292_s20] ss:$0 sm:$0xff]  ;;  %s4296_s20 = sld [smem:[#allocation29_spill]] }
 0x20e   : > { %v698_v44 = vadd.f32 1e-05, %v694_v42  ;;  %v699_v45 = vadd.f32 1e-05, %v695_v43 }
 0x20f   : > { %v692_v46 = vpop.xlane.xlu1 %691 }
 0x210   : > { %3101 = vrsqrt.f32 %v698_v44  ;;  %v696_v47 = vmul.f32 0.0078125, %v692_v46 }
 0x211   : > { %3103 = vrsqrt.f32 %v699_v45 }
 0x212   : > { %v700_v48 = vadd.f32 1e-05, %v696_v47 }
 0x214   : > { %3105 = vrsqrt.f32 %v700_v48 }
 0x216   : > { %v3100_v49 = vpop.eup %3099 }
 0x217   : > { %v705_v50 = vmul.f32 %v3100_v49, %v3855_v10  ;;  %v3005_v10 = vld [vmem:[#allocation9 + $0x10] sm:$0xff]  }
 0x219   : > { %v715_v55 = vmul.f32 %v2528_v51, %v705_v50 }
 0x21a   : > { %v3102_v52 = vpop.eup %3101 }
 0x21b   : > { %v3104_v53 = vpop.eup %3103  ;;  %v706_v54 = vmul.f32 %v3102_v52, %v3863_v17  ;;  %v725_v60 = vadd.f32 %v2529_v56, %v715_v55  ;;  %v2530_v17 = vld [vmem:[%s4236_s4] ss:$0 sm:$0xff] }
 0x21c   : > { %v707_v57 = vmul.f32 %v3104_v53, %v3858_v11  ;;  %v3006_v11 = vld [vmem:[#allocation9 + $0x18] sm:$0xff]  }
 0x21d   : > { %v716_v58 = vmul.f32 %v2528_v51, %v706_v54 }
 0x21e   : > { %v3106_v59 = vpop.eup %3105  ;;  %v717_v63 = vmul.f32 %v2528_v51, %v707_v57 }
 0x21f   : > { %v726_v61 = vadd.f32 %v2529_v56, %v716_v58  ;;  %v708_v62 = vmul.f32 %v3106_v59, %v3866_v18  ;;  %v2539_v18 = vld [vmem:[%s4238_s6] ss:$0 sm:$0xff] }
 0x220   : > { %v727_v6 = vadd.f32 %v2529_v56, %v717_v63 }
 0x221   : > { %v729_v4 = vpack.c.bf16 %v726_v61, %v725_v60  ;;  %v718_v5 = vmul.f32 %v2528_v51, %v708_v62 }
 0x223   : > { %2765 = vmatprep.mubr.bf16.mxu0 %v729_v4  ;;  %2785 = vmatprep.mubr.bf16.mxu1 %v729_v4  ;;  %v728_v7 = vadd.f32 %v2529_v56, %v718_v5 }
 0x225   : > { %v730_v8 = vpack.c.bf16 %v728_v7, %v727_v6 }
 0x227   : > { %2766 = vmatmul.mubr.bf16.vlgmr.msra.gmra.mrb[0].mxu0 %v730_v8  ;;  %2786 = vmatmul.mubr.bf16.vlgmr.msra.gmra.mrb[0].mxu1 %v730_v8 }
 0x228   : > { %2790 = vmatpush3.bf16.msra.mxu0 %v3003_v36  ;;  %2805 = vmatprep.mubr.bf16.mxu0 %v729_v4 }
 0x229   : > { %2791 = vmatprep.subr.bf16.mxu0 %v3004_v9  ;;  %2811 = vmatprep.mubr.msk.bf16.mxu1 %vm3455_vm0, %v3454_v16 }
 0x22c   : > { %2792 = vmatpush3.bf16.msra.mxu0 %v3004_v9 }
 0x22d   : > { %2793 = vmatprep.subr.bf16.mxu0 %v3005_v10 }
 0x230   : > { %2794 = vmatpush3.bf16.msra.mxu0 %v3005_v10 }
 0x231   : > { %2795 = vmatprep.subr.bf16.mxu0 %v3006_v11 }
 0x234   : > { %2796 = vmatpush3.bf16.msra.mxu0 %v3006_v11 }
 0x235   : > { %2797 = vmatprep.subr.bf16.mxu0 %v3007_v12 }
 0x238   : > { %2798 = vmatpush3.bf16.msra.mxu0 %v3007_v12 }
 0x239   : > { %2799 = vmatprep.subr.bf16.mxu0 %v3008_v13 }
 0x23c   : > { %2800 = vmatpush3.bf16.msra.mxu0 %v3008_v13 }
 0x23d   : > { %2801 = vmatprep.subr.bf16.mxu0 %v3009_v14 }
 0x240   : > { %2802 = vmatpush3.bf16.msra.mxu0 %v3009_v14 }
 0x241   : > { %2803 = vmatprep.subr.bf16.mxu0 %v3010_v15 }
 0x244   : > { %2804 = vmatpush3.bf16.msra.mxu0 %v3010_v15 }
 0x247   : > { %2806 = vmatmul.mubr.bf16.vlgmr.msra.gmra.mrb[4].mxu0 %v730_v8 }
 0x2fa   : > { %v2767_v19 = vpop.f32.mrb[0].mxu0  ;;  %v2787_v20 = vpop.f32.mrb[0].mxu1 }
 0x2fb   : > { %v3893_v21 = vadd.f32 %v2767_v19, %v2530_v17  ;;  %v3895_v22 = vadd.f32 %v2787_v20, %v2539_v18  ;;  %v836_v23 = vpop.f32.mrb[1].mxu0  ;;  %v958_v24 = vpop.f32.mrb[1].mxu1 }
 0x2fc   : > { %v2768_v25 = vpop.f32.mrb[2].mxu0  ;;  %v2788_v26 = vpop.f32.mrb[2].mxu1  ;;  %v837_v31 = vadd.f32 %v2530_v17, %v836_v23  ;;  %v959_v32 = vadd.f32 %v2539_v18, %v958_v24 }
 0x2fd   : > { %v3897_v27 = vadd.f32 %v2768_v25, %v2530_v17  ;;  %v3899_v28 = vadd.f32 %v2788_v26, %v2539_v18  ;;  %v839_v29 = vpop.f32.mrb[3].mxu0  ;;  %v961_v30 = vpop.f32.mrb[3].mxu1 }
 0x2fe   : > { %v840_v33 = vadd.f32 %v2530_v17, %v839_v29  ;;  %v962_v34 = vadd.f32 %v2539_v18, %v961_v30 }
 0x2ff   : > { %v852_v35 = vpack.c.bf16 %v3897_v27, %v3893_v21  ;;  %v974_v36 = vpack.c.bf16 %v3899_v28, %v3895_v22 }
 0x300   : > { %v851_v37 = vpack.c.bf16 %v840_v33, %v837_v31  ;;  %v973_v38 = vpack.c.bf16 %v962_v34, %v959_v32 }
 0x302   : > { %2810 = vmatpush3.bf16.xpose.msra.mxu1 %v973_v38  ;;  %v3011_v38 = vld [vmem:[#allocation11] sm:$0xff]  }
 0x303   : > { %2815 = vmatprep.subr.bf16.mxu1 %v3454_v16  ;;  %2833 = vmatprep.subr.bf16.mxu0 %v3011_v38 }
 0x304   : > { %2834 = vmatpush3.bf16.msra.mxu0 %v3011_v38  ;;  %v3040_v38 = vld [vmem:[#allocation12 + $0x68] ss:$16 sps:$4 sm:$0xff]  }
 0x309   : > { %2812 = vmatmul.mubr.bf16.vlgmr.msra.gmra.mrb[4].mxu1 %v851_v37 }
 0x30a   : > { %2817 = vmatprep.mubr.msk.bf16.mxu1 %vm3455_vm0, %v3454_v16 }
 0x31a   : > { %v2807_v40 = vpop.f32.mrb[4].mxu0 }
 0x31b   : > { %v1089_v41 = vadd.f32 %v2807_v40, %v2548_v39  ;;  %v1080_v42 = vpop.f32.mrb[5].mxu0  ;;  %v3013_v40 = vld [vmem:[#allocation11 + $0x10] sm:$0xff]  }
 0x31c   : > { %v2808_v43 = vpop.f32.mrb[6].mxu0  ;;  %v1081_v46 = vadd.f32 %v2548_v39, %v1080_v42  ;;  %v3015_v42 = vld [vmem:[#allocation11 + $0x20] sm:$0xff]  }
 0x31d   : > { %v1092_v44 = vadd.f32 %v2808_v43, %v2548_v39  ;;  %v1083_v45 = vpop.f32.mrb[7].mxu0  ;;  %v3016_v43 = vld [vmem:[#allocation11 + $0x28] sm:$0xff]  }
 0x31e   : > { %v1084_v47 = vadd.f32 %v2548_v39, %v1083_v45  ;;  %v3012_v39 = vld [vmem:[#allocation11 + $0x8] sm:$0xff]  }
 0x31f   : > { %v1096_v48 = vpack.c.bf16 %v1092_v44, %v1089_v41  ;;  %2835 = vmatprep.subr.bf16.mxu0 %v3012_v39  ;;  %v3014_v41 = vld [vmem:[#allocation11 + $0x18] sm:$0xff]   ;;  %v3017_v44 = vld [vmem:[#allocation11 + $0x30] sm:$0xff]  }
 0x320   : > { %v1095_v49 = vpack.c.bf16 %v1084_v47, %v1081_v46  ;;  %2836 = vmatpush3.bf16.msra.mxu0 %v3012_v39  ;;  %v3045_v39 = vld [vmem:[#allocation12 + $0x84] ss:$16 sps:$4 sm:$0xff]  }
 0x321   : > { %2837 = vmatprep.subr.bf16.mxu0 %v3013_v40 }
 0x322   : > { %2816 = vmatpush3.bf16.msra.mxu1 %v1095_v49 }
 0x323   : > { %2821 = vmatprep.subr.bf16.mxu1 %v3454_v16 }
 0x324   : > { %2838 = vmatpush3.bf16.msra.mxu0 %v3013_v40  ;;  %v3048_v40 = vld [vmem:[#allocation12 + $0x8c] ss:$16 sps:$4 sm:$0xff]  }
 0x325   : > { %2839 = vmatprep.subr.bf16.mxu0 %v3014_v41 }
 0x328   : > { %2840 = vmatpush3.bf16.msra.mxu0 %v3014_v41  ;;  %v3043_v41 = vld [vmem:[#allocation12 + $0x80] ss:$16 sps:$4 sm:$0xff]  }
 0x329   : > { %2841 = vmatprep.subr.bf16.mxu0 %v3015_v42 }
 0x32c   : > { %2842 = vmatpush3.bf16.msra.mxu0 %v3015_v42  ;;  %v3046_v42 = vld [vmem:[#allocation12 + $0x88] ss:$16 sps:$4 sm:$0xff]  }
 0x32d   : > { %2843 = vmatprep.subr.bf16.mxu0 %v3016_v43 }
 0x330   : > { %2844 = vmatpush3.bf16.msra.mxu0 %v3016_v43  ;;  %v3051_v43 = vld [vmem:[#allocation12 + $0xa4] ss:$16 sps:$4 sm:$0xff]  }
 0x331   : > { %2845 = vmatprep.subr.bf16.mxu0 %v3017_v44 }
 0x334   : > { %2846 = vmatpush3.bf16.msra.mxu0 %v3017_v44  ;;  %v3054_v44 = vld [vmem:[#allocation12 + $0xac] ss:$16 sps:$4 sm:$0xff]  }
 0x3dc   : > { %v1131_v50 = vpop.f32.mrb[4].mxu1 }
 0x3dd   : > { %v1138_v51 = vmul.f32 0.088388346, %v1131_v50  ;;  %v2813_v52 = vpop.f32.mrb[5].mxu1 }
 0x3de   : > { %v1134_v53 = vpop.f32.mrb[6].mxu1  ;;  %v3018_v52 = vld [vmem:[#allocation11 + $0x38] sm:$0xff]  }
 0x3df   : > { %v1139_v54 = vmul.f32 0.088388346, %v1134_v53  ;;  %v2814_v55 = vpop.f32.mrb[7].mxu1  ;;  %v1141_v56 = vsel %vm1140_vm1, %v1138_v51, -inf  ;;  %2847 = vmatprep.subr.bf16.mxu0 %v3018_v52 }
 0x3e0   : > { %1142 = vmax.xlane.f32.xlu0 %v1141_v56  ;;  %2848 = vmatpush3.bf16.msra.mxu0 %v3018_v52  ;;  %v3066_v52 = vld [vmem:[#allocation12 + $0xec] ss:$16 sps:$4 sm:$0xff]  }
 0x3e1   : > { %v1144_v57 = vsel %vm1140_vm1, %v1139_v54, -inf }
 0x3e2   : > { %1145 = vmax.xlane.f32.xlu1 %v1144_v57 }
 0x46d   : > { %v1143_v58 = vpop.xlane.xlu0 %1142 }
 0x46e   : > { %v1147_v59 = vsub.f32 %v1138_v51, %v1143_v58  ;;  %v2559_v58 = vld [vmem:[%s4293_s28] ss:$0 sm:$0xff]  ;;  %s4297_s28 = sld [smem:[#allocation30_spill]] }
 0x46f   : > { %v1146_v60 = vpop.xlane.xlu1 %1145 }
 0x470   : > { %v1149_v61 = vmul.f32 1.442695, %v1147_v59  ;;  %v1148_v62 = vsub.f32 %v1139_v54, %v1146_v60 }
 0x472   : > { %3107 = vpow2.f32 %v1149_v61  ;;  %v1151_v63 = vmul.f32 1.442695, %v1148_v62 }
 0x474   : > { %3109 = vpow2.f32 %v1151_v63 }
 0x47c   : > { %v3108_v4 = vpop.eup %3107 }
 0x47d   : > { %v1153_v5 = vsel %vm1140_vm1, %v3108_v4, 0.0 }
 0x47e   : > { %v3110_v6 = vpop.eup %3109  ;;  %1154 = vadd.xlane.f32.xlu0 %v1153_v5 }
 0x47f   : > { %v1156_v7 = vsel %vm1140_vm1, %v3110_v6, 0.0 }
 0x480   : > { %1157 = vadd.xlane.f32.xlu1 %v1156_v7 }
 0x50b   : > { %v1155_v8 = vpop.xlane.xlu0 %1154 }
 0x50c   : > { %3111 = vrcp.f32 %v1155_v8 }
 0x50d   : > { %v1158_v9 = vpop.xlane.xlu1 %1157 }
 0x50e   : > { %3113 = vrcp.f32 %v1158_v9 }
 0x516   : > { %v3112_v10 = vpop.eup %3111 }
 0x517   : > { %v1161_v12 = vmul.f32 %v3112_v10, %v3108_v4 }
 0x518   : > { %v3114_v11 = vpop.eup %3113 }
 0x519   : > { %v1162_v13 = vmul.f32 %v3114_v11, %v3110_v6  ;;  %v3021_v11 = vld [vmem:[#allocation12 + $0x4] ss:$16 sps:$4 sm:$0xff]  }
 0x51b   : > { %v1163_v14 = vpack.c.bf16 %v1162_v13, %v1161_v12  ;;  %v3022_v12 = vld [vmem:[#allocation12 + $0x8] ss:$16 sps:$4 sm:$0xff]   ;;  %v3024_v13 = vld [vmem:[#allocation12 + $0xc] ss:$16 sps:$4 sm:$0xff]  }
 0x51c   : > { %1787 = vmatprep.subr.bf16.mxu0 %v3024_v13 }
 0x51d   : > { %2818 = vmatmul.mubr.msk.bf16.vlgmr.msra.gmra.mrb[8].mxu1 %vm1140_vm1, %v1163_v14  ;;  %v3030_v14 = vld [vmem:[#allocation12 + $0x2c] ss:$16 sps:$4 sm:$0xff]  }
 0x51e   : > { %2822 = vmatpush3.bf16.xpose.msra.mxu1 %v974_v36  ;;  %2823 = vmatprep.mubr.msk.bf16.mxu1 %vm3455_vm0, %v3454_v16 }
 0x51f   : > { %2827 = vmatprep.subr.bf16.mxu1 %v3454_v16 }
 0x525   : > { %2824 = vmatmul.mubr.bf16.vlgmr.msra.gmra.mrb[12].mxu1 %v852_v35 }
 0x526   : > { %2828 = vmatpush3.bf16.msra.mxu1 %v1096_v48  ;;  %2829 = vmatprep.mubr.msk.bf16.mxu1 %vm3455_vm0, %v3454_v16 }
 0x527   : > { %1734 = vmatprep.subr.bf16.mxu1 %v3021_v11 }
 0x5f0   : > { %v1201_v15 = vpop.f32.mrb[8].mxu1 }
 0x5f1   : > { %v2819_v17 = vpop.f32.mrb[9].mxu1 }
 0x5f2   : > { %v1204_v18 = vpop.f32.mrb[10].mxu1 }
 0x5f3   : > { %v1326_v19 = vpack.c.bf16 %v1204_v18, %v1201_v15  ;;  %v2820_v20 = vpop.f32.mrb[11].mxu1  ;;  %v3028_v15 = vld [vmem:[#allocation12 + $0x28] ss:$16 sps:$4 sm:$0xff]  }
 0x5f5   : > { %2849 = vmatprep.mubr.bf16.mxu0 %v1326_v19 }
 0x5f8   : > { %v1244_v21 = vpop.f32.mrb[12].mxu1 }
 0x5f9   : > { %v1251_v22 = vmul.f32 0.088388346, %v1244_v21  ;;  %v2825_v23 = vpop.f32.mrb[13].mxu1 }
 0x5fa   : > { %v1247_v24 = vpop.f32.mrb[14].mxu1 }
 0x5fb   : > { %v1252_v25 = vmul.f32 0.088388346, %v1247_v24  ;;  %v2826_v26 = vpop.f32.mrb[15].mxu1  ;;  %v1253_v27 = vsel %vm1140_vm1, %v1251_v22, -inf }
 0x5fc   : > { %1254 = vmax.xlane.f32.xlu0 %v1253_v27 }
 0x5fd   : > { %v1256_v28 = vsel %vm1140_vm1, %v1252_v25, -inf }
 0x5fe   : > { %1257 = vmax.xlane.f32.xlu1 %v1256_v28 }
 0x689   : > { %v1255_v29 = vpop.xlane.xlu0 %1254 }
 0x68a   : > { %v1259_v16 = vsub.f32 %v1251_v22, %v1255_v29 }
 0x68b   : > { %v1258_v30 = vpop.xlane.xlu1 %1257 }
 0x68c   : > { %v1261_v31 = vmul.f32 1.442695, %v1259_v16  ;;  %v1260_v32 = vsub.f32 %v1252_v25, %v1258_v30 }
 0x68e   : > { %3115 = vpow2.f32 %v1261_v31  ;;  %v1263_v33 = vmul.f32 1.442695, %v1260_v32  ;;  %v3033_v31 = vld [vmem:[#allocation12 + $0x44] ss:$16 sps:$4 sm:$0xff]   ;;  %v3036_v32 = vld [vmem:[#allocation12 + $0x4c] ss:$16 sps:$4 sm:$0xff]  }
 0x690   : > { %3117 = vpow2.f32 %v1263_v33  ;;  %v3031_v33 = vld [vmem:[#allocation12 + $0x40] ss:$16 sps:$4 sm:$0xff]  }
 0x698   : > { %v3116_v34 = vpop.eup %3115 }
 0x699   : > { %v1265_v35 = vsel %vm1140_vm1, %v3116_v34, 0.0 }
 0x69a   : > { %v3118_v36 = vpop.eup %3117  ;;  %1266 = vadd.xlane.f32.xlu0 %v1265_v35  ;;  %v3039_v35 = vld [vmem:[#allocation12 + $0x64] ss:$16 sps:$4 sm:$0xff]  }
 0x69b   : > { %v1268_v37 = vsel %vm1140_vm1, %v3118_v36, 0.0 }
 0x69c   : > { %1269 = vadd.xlane.f32.xlu1 %v1268_v37  ;;  %v3037_v37 = vld [vmem:[#allocation12 + $0x60] ss:$16 sps:$4 sm:$0xff]  }
 0x727   : > { %v1267_v45 = vpop.xlane.xlu0 %1266 }
 0x728   : > { %3119 = vrcp.f32 %v1267_v45  ;;  %v3049_v45 = vld [vmem:[#allocation12 + $0xa0] ss:$16 sps:$4 sm:$0xff]  }
 0x729   : > { %v1270_v46 = vpop.xlane.xlu1 %1269 }
 0x72a   : > { %3121 = vrcp.f32 %v1270_v46  ;;  %v3052_v46 = vld [vmem:[#allocation12 + $0xa8] ss:$16 sps:$4 sm:$0xff]  }
 0x732   : > { %v3120_v47 = vpop.eup %3119 }
 0x733   : > { %v1273_v49 = vmul.f32 %v3120_v47, %v3116_v34  ;;  %v3034_v34 = vld [vmem:[#allocation12 + $0x48] ss:$16 sps:$4 sm:$0xff]   ;;  %v3057_v47 = vld [vmem:[#allocation12 + $0xc4] ss:$16 sps:$4 sm:$0xff]  }
 0x734   : > { %v3122_v48 = vpop.eup %3121 }
 0x735   : > { %v1274_v50 = vmul.f32 %v3122_v48, %v3118_v36  ;;  %v3042_v36 = vld [vmem:[#allocation12 + $0x6c] ss:$16 sps:$4 sm:$0xff]  }
 0x736   : > { %v3060_v48 = vld [vmem:[#allocation12 + $0xcc] ss:$16 sps:$4 sm:$0xff]  }
 0x737   : > { %v1275_v51 = vpack.c.bf16 %v1274_v50, %v1273_v49  ;;  %v3055_v49 = vld [vmem:[#allocation12 + $0xc0] ss:$16 sps:$4 sm:$0xff]   ;;  %v3058_v50 = vld [vmem:[#allocation12 + $0xc8] ss:$16 sps:$4 sm:$0xff]  }
 0x739   : > { %2830 = vmatmul.mubr.msk.bf16.vlgmr.msra.gmra.mrb[16].mxu1 %vm1140_vm1, %v1275_v51  ;;  %v3063_v51 = vld [vmem:[#allocation12 + $0xe4] ss:$16 sps:$4 sm:$0xff]  }
 0x80c   : > { %v1313_v53 = vpop.f32.mrb[16].mxu1 }
 0x80d   : > { %v2831_v54 = vpop.f32.mrb[17].mxu1 }
 0x80e   : > { %v1316_v55 = vpop.f32.mrb[18].mxu1  ;;  %v3064_v54 = vld [vmem:[#allocation12 + $0xe8] ss:$16 sps:$4 sm:$0xff]  }
 0x80f   : > { %v1327_v56 = vpack.c.bf16 %v1316_v55, %v1313_v53  ;;  %v2832_v57 = vpop.f32.mrb[19].mxu1  ;;  %v3061_v53 = vld [vmem:[#allocation12 + $0xe0] ss:$16 sps:$4 sm:$0xff]   ;;  %v3456_v55 = vmov 0  }
 0x810   : > { %1766 = vmatprep.mubr.bf16.mxu1 %v3456_v55 }
 0x811   : > { %2850 = vmatmul.mubr.bf16.vlgmr.msra.gmra.mrb[8].mxu0 %v1327_v56 }
 0x812   : > { %1788 = vmatpush1.bf16.msra.mxu0 %v3022_v12  ;;  %1819 = vmatprep.mubr.bf16.mxu0 %v3456_v55  ;;  %v2568_v12 = vld [vmem:[%s4294_s22] ss:$0 sm:$0xff] }
 0x813   : > { %1789 = vmatprep.subr.bf16.mxu0 %v3030_v14 }
 0x816   : > { %1790 = vmatpush1.bf16.msra.mxu0 %v3028_v15 }
 0x817   : > { %1791 = vmatprep.subr.bf16.mxu0 %v3036_v32  ;;  %v3069_v32 = vld [vmem:[#allocation14 + $0xc0] sm:$0xff]  }
 0x81a   : > { %1792 = vmatpush1.bf16.msra.mxu0 %v3034_v34  ;;  %v3979_v34 = vld [vmem:[#allocation14 + $0xc8] sm:$0xff]  }
 0x81b   : > { %1793 = vmatprep.subr.bf16.mxu0 %v3042_v36  ;;  %v3075_v36 = vld [vmem:[#allocation14 + $0x50] sm:$0xff]  }
 0x81e   : > { %1794 = vmatpush1.bf16.msra.mxu0 %v3040_v38  ;;  %v3985_v38 = vld [vmem:[#allocation14 + $0xd0] sm:$0xff]  }
 0x81f   : > { %1795 = vmatprep.subr.bf16.mxu0 %v3048_v40  ;;  %v3079_v40 = vld [vmem:[#allocation14 + $0x58] sm:$0xff]  }
 0x822   : > { %1796 = vmatpush1.bf16.msra.mxu0 %v3046_v42  ;;  %v3991_v42 = vld [vmem:[#allocation14 + $0xd8] sm:$0xff]  }
 0x823   : > { %1797 = vmatprep.subr.bf16.mxu0 %v3054_v44  ;;  %v3083_v44 = vld [vmem:[#allocation14 + $0x60] sm:$0xff]  }
 0x826   : > { %1798 = vmatpush1.bf16.msra.mxu0 %v3052_v46  ;;  %v3997_v46 = vld [vmem:[#allocation14 + $0xe0] sm:$0xff]  }
 0x827   : > { %1799 = vmatprep.subr.bf16.mxu0 %v3060_v48  ;;  %v3087_v48 = vld [vmem:[#allocation14 + $0x68] sm:$0xff]  }
 0x82a   : > { %1800 = vmatpush1.bf16.msra.mxu0 %v3058_v50  ;;  %v4003_v50 = vld [vmem:[#allocation14 + $0xe8] sm:$0xff]  }
 0x82b   : > { %1801 = vmatprep.subr.bf16.mxu0 %v3066_v52  ;;  %v3091_v52 = vld [vmem:[#allocation14 + $0x70] sm:$0xff]  }
 0x82e   : > { %1802 = vmatpush1.bf16.msra.mxu0 %v3064_v54  ;;  %v4008_v54 = vld [vmem:[#allocation14 + $0xf0] sm:$0xff]  }
 0x82f   : > { %2721 = vmatprep.subr.bf16.mxu0 %v3069_v32 }
 0x8e4   : > { %v2851_v59 = vpop.f32.mrb[8].mxu0 }
 0x8e5   : > { %v1433_v60 = vpop.f32.mrb[9].mxu0  ;;  %v1442_v4 = vadd.f32 %v2851_v59, %v2559_v58 }
 0x8e6   : > { %v1434_v61 = vadd.f32 %v2559_v58, %v1433_v60  ;;  %v2852_v62 = vpop.f32.mrb[10].mxu0 }
 0x8e7   : > { %v1436_v63 = vpop.f32.mrb[11].mxu0  ;;  %v1445_v7 = vadd.f32 %v2852_v62, %v2559_v58  ;;  %v3938_v9 = vadd.f32 %v1442_v4, %v3844_v1  ;;  %v3025_v1 = vld [vmem:[#allocation12 + $0x20] ss:$16 sps:$4 sm:$0xff]  }
 0x8e8   : > { %v3931_v5 = vadd.f32 %v1434_v61, %v3842_v0  ;;  %v1437_v6 = vadd.f32 %v2559_v58, %v1436_v63  ;;  %v3019_v0 = vld [vmem:[#allocation12] ss:$16 sps:$4 sm:$0xff]  }
 0x8e9   : > { %v3942_v10 = vadd.f32 %v1445_v7, %v3850_v3  ;;  %1735 = vmatpush1.bf16.msra.mxu1 %v3019_v0 }
 0x8ea   : > { %v3934_v8 = vadd.f32 %v1437_v6, %v3846_v2  ;;  %1454 = vadd.xlane.f32.xlu0 %v3931_v5  ;;  %v3027_v2 = vld [vmem:[#allocation12 + $0x24] ss:$16 sps:$4 sm:$0xff]  }
 0x8eb   : > { %1736 = vmatprep.subr.bf16.mxu1 %v3027_v2 }
 0x8ec   : > { %1456 = vadd.xlane.f32.xlu1 %v3934_v8 }
 0x8ed   : > { %1737 = vmatpush1.bf16.msra.mxu1 %v3025_v1 }
 0x8ee   : > { %1458 = vadd.xlane.f32.xlu0 %v3938_v9  ;;  %1738 = vmatprep.subr.bf16.mxu1 %v3033_v31  ;;  %v3068_v31 = vld [vmem:[#allocation14] sm:$0xff]  }
 0x8f0   : > { %1460 = vadd.xlane.f32.xlu1 %v3942_v10 }
 0x8f1   : > { %1739 = vmatpush1.bf16.msra.mxu1 %v3031_v33  ;;  %v3072_v33 = vld [vmem:[#allocation14 + $0x8] sm:$0xff]  }
 0x8f2   : > { %1740 = vmatprep.subr.bf16.mxu1 %v3039_v35  ;;  %v3981_v35 = vld [vmem:[#allocation14 + $0x88] sm:$0xff]  }
 0x8f5   : > { %1741 = vmatpush1.bf16.msra.mxu1 %v3037_v37  ;;  %v3076_v37 = vld [vmem:[#allocation14 + $0x10] sm:$0xff]  }
 0x8f6   : > { %1742 = vmatprep.subr.bf16.mxu1 %v3045_v39  ;;  %v3988_v39 = vld [vmem:[#allocation14 + $0x90] sm:$0xff]  }
 0x8f9   : > { %1743 = vmatpush1.bf16.msra.mxu1 %v3043_v41  ;;  %v3080_v41 = vld [vmem:[#allocation14 + $0x18] sm:$0xff]  }
 0x8fa   : > { %1744 = vmatprep.subr.bf16.mxu1 %v3051_v43  ;;  %v3993_v43 = vld [vmem:[#allocation14 + $0x98] sm:$0xff]  }
 0x8fd   : > { %1745 = vmatpush1.bf16.msra.mxu1 %v3049_v45  ;;  %v3084_v45 = vld [vmem:[#allocation14 + $0x20] sm:$0xff]  }
 0x8fe   : > { %1746 = vmatprep.subr.bf16.mxu1 %v3057_v47  ;;  %v3999_v47 = vld [vmem:[#allocation14 + $0xa0] sm:$0xff]  }
 0x901   : > { %1747 = vmatpush1.bf16.msra.mxu1 %v3055_v49  ;;  %v3088_v49 = vld [vmem:[#allocation14 + $0x28] sm:$0xff]  }
 0x902   : > { %1748 = vmatprep.subr.bf16.mxu1 %v3063_v51  ;;  %v4005_v51 = vld [vmem:[#allocation14 + $0xa8] sm:$0xff]  }
 0x905   : > { %1749 = vmatpush1.bf16.msra.mxu1 %v3061_v53  ;;  %v3092_v53 = vld [vmem:[#allocation14 + $0x30] sm:$0xff]  }
 0x977   : > { %v1455_v3 = vpop.xlane.xlu0 %1454 }
 0x978   : > { %v1462_v17 = vmul.f32 0.0078125, %v1455_v3  ;;  %v2569_v3 = vld [vmem:[%s4295_s19] ss:$0 sm:$0xff]  ;;  %s4187_s19 = scalar_lea.hbm %s4298_s10, %s2644_s12 }
 0x979   : > { %v1457_v18 = vpop.xlane.xlu1 %1456 }
 0x97a   : > { %v3947_v19 = vsub.f32 %v3931_v5, %v1462_v17  ;;  %v1463_v20 = vmul.f32 0.0078125, %v1457_v18 }
 0x97b   : > { %v1459_v21 = vpop.xlane.xlu0 %1458 }
 0x97c   : > { %v3950_v22 = vsub.f32 %v3934_v8, %v1463_v20  ;;  %v1464_v23 = vmul.f32 0.0078125, %v1459_v21  ;;  %v1470_v24 = vmul.f32 %v3947_v19, %v3947_v19 }
 0x97d   : > { %v1461_v25 = vpop.xlane.xlu1 %1460 }
 0x97e   : > { %v3955_v26 = vsub.f32 %v3938_v9, %v1464_v23  ;;  %v1465_v27 = vmul.f32 0.0078125, %v1461_v25  ;;  %1474 = vadd.xlane.f32.xlu0 %v1470_v24  ;;  %v1471_v28 = vmul.f32 %v3950_v22, %v3950_v22 }
 0x980   : > { %v3960_v29 = vsub.f32 %v3942_v10, %v1465_v27  ;;  %1476 = vadd.xlane.f32.xlu1 %v1471_v28  ;;  %v1472_v16 = vmul.f32 %v3955_v26, %v3955_v26 }
 0x982   : > { %1478 = vadd.xlane.f32.xlu0 %v1472_v16  ;;  %v1473_v30 = vmul.f32 %v3960_v29, %v3960_v29 }
 0x984   : > { %1480 = vadd.xlane.f32.xlu1 %v1473_v30  ;;  %v3067_v30 = vld [vmem:[#allocation14 + $0x40] sm:$0xff]  }
 0x985   : > { %2693 = vmatprep.subr.bf16.mxu1 %v3067_v30 }
 0xa0b   : > { %v1475_v56 = vpop.xlane.xlu0 %1474 }
 0xa0c   : > { %v1482_v57 = vmul.f32 0.0078125, %v1475_v56  ;;  %v3095_v56 = vld [vmem:[#allocation14 + $0x78] sm:$0xff]  }
 0xa0d   : > { %v1477_v58 = vpop.xlane.xlu1 %1476 }
 0xa0e   : > { %v1486_v59 = vadd.f32 1e-05, %v1482_v57  ;;  %v1483_v60 = vmul.f32 0.0078125, %v1477_v58  ;;  %v4014_v57 = vld [vmem:[#allocation14 + $0xf8] sm:$0xff]  }
 0xa0f   : > { %v1479_v61 = vpop.xlane.xlu0 %1478  ;;  %v3096_v58 = vld [vmem:[#allocation14 + $0x38] sm:$0xff]  }
 0xa10   : > { %3123 = vrsqrt.f32 %v1486_v59  ;;  %v1487_v62 = vadd.f32 1e-05, %v1483_v60  ;;  %v1484_v63 = vmul.f32 0.0078125, %v1479_v61  ;;  %v4017_v59 = vld [vmem:[#allocation14 + $0xb8] sm:$0xff]   ;;  %v1554_v60 = vlaneseq }
 0xa11   : > { %v1481_v4 = vpop.xlane.xlu1 %1480 }
 0xa12   : > { %3125 = vrsqrt.f32 %v1487_v62  ;;  %v1488_v6 = vadd.f32 1e-05, %v1484_v63  ;;  %v1485_v7 = vmul.f32 0.0078125, %v1481_v4  ;;  %v1555_v61 = vshrl.u32 %v1554_v60, 7  ;;  %v1552_v4 = vld [vmem:[%s4296_s20] sm:$0xf] }
 0xa13   : > { %s3365_s20 = sshll.u32 %s3457_s0, 4  ;;  %s3366_s20 = int_to_ptr.vmem [resolvable:$false] %s3365_s20 }
 0xa14   : > { %3127 = vrsqrt.f32 %v1488_v6  ;;  %v1489_v0 = vadd.f32 1e-05, %v1485_v7  ;;  %v1556_v62 = vsub.s32 0, %v1555_v61  ;;  %v1564_v63 = vsub.s32 2, %v1555_v61  ;;  %s3367_s30 = scalar_lea.vmem %s3366_s20, 1024  ;;  %p3368_p13 = scmp.lt.s32.totalorder %s4181_s1, %s3366_s20 }
 0xa15   : > { %v1560_v6 = vsub.s32 1, %v1555_v61  ;;  %v1568_v7 = vsub.s32 3, %v1555_v61  ;;  %p3369_p0 = scmp.lt.s32.totalorder %s3367_s30, %s3361_s14 }
 0xa16   : > { %3129 = vrsqrt.f32 %v1489_v0  ;;  %v4024_v0 = vrot.slane %v1552_v4, %v1556_v62 }
 0xa17   : > { %p3370_p2 = por %p3369_p0, %p3368_p13 }
 0xa19   : > { %p3371_p8 = pnand %p3370_p2, %p3364_p1 }
 0xa1a   : > { %v3124_v11 = vpop.eup %3123 }
 0xa1b   : > { %v1494_v13 = vmul.f32 %v3124_v11, %v3947_v19  ;;  %v4026_v11 = vrot.slane %v1552_v4, %v1564_v63 }
 0xa1c   : > { %v3126_v2 = vpop.eup %3125 }
 0xa1d   : > { %v1495_v14 = vmul.f32 %v3126_v2, %v3950_v22  ;;  %v1504_v1 = vmul.f32 %v2568_v12, %v1494_v13 }
 0xa1e   : > { %v3128_v15 = vpop.eup %3127 }
 0xa1f   : > { %v1505_v17 = vmul.f32 %v2568_v12, %v1495_v14  ;;  %v1514_v20 = vadd.f32 %v2569_v3, %v1504_v1  ;;  %v1496_v23 = vmul.f32 %v3128_v15, %v3955_v26  ;;  %v3976_v26 = vld [vmem:[#allocation14 + $0x80] sm:$0xff]   ;;  %v4030_v14 = vrot.slane %v1552_v4, %v1568_v7 }
 0xa20   : > { %v3130_v18 = vpop.eup %3129 }
 0xa21   : > { %v1515_v21 = vadd.f32 %v2569_v3, %v1505_v17  ;;  %v1497_v24 = vmul.f32 %v3130_v18, %v3960_v29  ;;  %v1506_v19 = vmul.f32 %v2568_v12, %v1496_v23  ;;  %v3071_v29 = vld [vmem:[#allocation14 + $0x48] sm:$0xff]  }
 0xa23   : > { %v1518_v25 = vpack.c.bf16 %v1515_v21, %v1514_v20  ;;  %v1507_v27 = vmul.f32 %v2568_v12, %v1497_v24  ;;  %v1516_v28 = vadd.f32 %v2569_v3, %v1506_v19  ;;  %v4028_v12 = vrot.slane %v1552_v4, %v1560_v6 }
 0xa25   : > { %1767 = vmatmul.mubr.bf16.vlgmr.msra.gmra.mrb[20].mxu1 %v1518_v25  ;;  %1820 = vmatmul.mubr.bf16.vlgmr.msra.gmra.mrb[12].mxu0 %v1518_v25  ;;  %v1517_v22 = vadd.f32 %v2569_v3, %v1507_v27 }
 0xa26   : > { %1776 = vmatprep.mubr.bf16.mxu1 %v3456_v55  ;;  %1829 = vmatprep.mubr.bf16.mxu0 %v3456_v55  ;;  %v4011_v55 = vld [vmem:[#allocation14 + $0xb0] sm:$0xff]  }
 0xa27   : > { %v1519_v16 = vpack.c.bf16 %v1517_v22, %v1516_v28  ;;  %2694 = vmatpush3.bf16.msra.mxu1 %v3068_v31  ;;  %2722 = vmatpush3.bf16.msra.mxu0 %v3976_v26 }
 0xa28   : > { %2695 = vmatprep.subr.bf16.mxu1 %v3071_v29  ;;  %2723 = vmatprep.subr.bf16.mxu0 %v3979_v34 }
 0xa2b   : > { %2696 = vmatpush3.bf16.msra.mxu1 %v3072_v33  ;;  %2724 = vmatpush3.bf16.msra.mxu0 %v3981_v35 }
 0xa2c   : > { %2697 = vmatprep.subr.bf16.mxu1 %v3075_v36  ;;  %2725 = vmatprep.subr.bf16.mxu0 %v3985_v38 }
 0xa2d   : > { %1777 = vmatmul.mubr.bf16.gmra.mrb[24].mxu1 %v1519_v16  ;;  %1830 = vmatmul.mubr.bf16.gmra.mrb[16].mxu0 %v1519_v16 }
 0xa2f   : > { %2698 = vmatpush3.bf16.msra.mxu1 %v3076_v37  ;;  %2726 = vmatpush3.bf16.msra.mxu0 %v3988_v39 }
 0xa30   : > { %2699 = vmatprep.subr.bf16.mxu1 %v3079_v40  ;;  %2727 = vmatprep.subr.bf16.mxu0 %v3991_v42 }
 0xa33   : > { %2700 = vmatpush3.bf16.msra.mxu1 %v3080_v41  ;;  %2728 = vmatpush3.bf16.msra.mxu0 %v3993_v43 }
 0xa34   : > { %2701 = vmatprep.subr.bf16.mxu1 %v3083_v44  ;;  %2729 = vmatprep.subr.bf16.mxu0 %v3997_v46 }
 0xa37   : > { %2702 = vmatpush3.bf16.msra.mxu1 %v3084_v45  ;;  %2730 = vmatpush3.bf16.msra.mxu0 %v3999_v47 }
 0xa38   : > { %2703 = vmatprep.subr.bf16.mxu1 %v3087_v48  ;;  %2731 = vmatprep.subr.bf16.mxu0 %v4003_v50 }
 0xa3b   : > { %2704 = vmatpush3.bf16.msra.mxu1 %v3088_v49  ;;  %2732 = vmatpush3.bf16.msra.mxu0 %v4005_v51 }
 0xa3c   : > { %2705 = vmatprep.subr.bf16.mxu1 %v3091_v52  ;;  %2733 = vmatprep.subr.bf16.mxu0 %v4008_v54 }
 0xa3f   : > { %2706 = vmatpush3.bf16.msra.mxu1 %v3092_v53  ;;  %2734 = vmatpush3.bf16.msra.mxu0 %v4011_v55 }
 0xa40   : > { %2707 = vmatprep.subr.bf16.mxu1 %v3095_v56  ;;  %2735 = vmatprep.subr.bf16.mxu0 %v4014_v57 }
 0xa43   : > { %2708 = vmatpush3.bf16.msra.mxu1 %v3096_v58  ;;  %2736 = vmatpush3.bf16.msra.mxu0 %v4017_v59 }
 0xa44   : > { %2853 = vmatprep.subr.bf16.mxu1 %v3069_v32 }
 0xaf8   : > { %v1768_v13 = vpop.f32.mrb[20].mxu1  ;;  %v1821_v2 = vpop.f32.mrb[12].mxu0 }
 0xaf9   : > { %v1769_v1 = vadd.f32 %v1768_v13, %v4024_v0  ;;  %v1822_v15 = vadd.f32 %v1821_v2, %v4026_v11  ;;  %v1770_v3 = vpop.f32.mrb[21].mxu1  ;;  %v1823_v17 = vpop.f32.mrb[13].mxu0 }
 0xafa   : > { %v4035_v18 = vadd.f32 %v1770_v3, %v4028_v12  ;;  %v1772_v20 = vpop.f32.mrb[22].mxu1  ;;  %v1825_v21 = vpop.f32.mrb[14].mxu0  ;;  %v4039_v27 = vadd.f32 %v1823_v17, %v4030_v14 }
 0xafb   : > { %v1856_v23 = vmul.f32 0.044715, %v1769_v1  ;;  %v1858_v24 = vmul.f32 0.044715, %v1822_v15  ;;  %v4042_v19 = vadd.f32 %v1772_v20, %v4024_v0  ;;  %v4045_v22 = vadd.f32 %v1825_v21, %v4026_v11  ;;  %v1774_v28 = vpop.f32.mrb[23].mxu1  ;;  %v1827_v16 = vpop.f32.mrb[15].mxu0 }
 0xafc   : > { %v1857_v25 = vmul.f32 0.044715, %v4035_v18  ;;  %v4048_v32 = vadd.f32 %v1774_v28, %v4028_v12  ;;  %v4051_v33 = vmul.f32 0.5, %v1769_v1  ;;  %v1859_v44 = vmul.f32 0.044715, %v4039_v27 }
 0xafd   : > { %v1872_v30 = vmul.f32 %v1856_v23, %v1769_v1  ;;  %v1874_v31 = vmul.f32 %v1858_v24, %v1822_v15  ;;  %v1860_v29 = vmul.f32 0.044715, %v4042_v19  ;;  %v1862_v40 = vmul.f32 0.044715, %v4045_v22 }
 0xafe   : > { %v1873_v41 = vmul.f32 %v1857_v25, %v4035_v18  ;;  %v4058_v48 = vadd.f32 %v1827_v16, %v4030_v14  ;;  %v1861_v60 = vmul.f32 0.044715, %v4048_v32  ;;  %v4062_v63 = vmul.f32 0.5, %v1822_v15 }
 0xaff   : > { %v1888_v36 = vmul.f32 %v1872_v30, %v1769_v1  ;;  %v1890_v37 = vmul.f32 %v1874_v31, %v1822_v15  ;;  %v1876_v45 = vmul.f32 %v1860_v29, %v4042_v19  ;;  %v1878_v58 = vmul.f32 %v1862_v40, %v4045_v22 }
 0xb00   : > { %v1778_v49 = vpop.f32.mrb[24].mxu1  ;;  %v1831_v52 = vpop.f32.mrb[16].mxu0  ;;  %v1889_v23 = vmul.f32 %v1873_v41, %v4035_v18  ;;  %v1863_v25 = vmul.f32 0.044715, %v4058_v48  ;;  %v1877_v16 = vmul.f32 %v1861_v60, %v4048_v32 }
 0xb01   : > { %v1904_v53 = vadd.f32 %v1888_v36, %v1769_v1  ;;  %v1906_v56 = vadd.f32 %v1890_v37, %v1822_v15  ;;  %v1780_v61 = vpop.f32.mrb[25].mxu1  ;;  %v1833_v62 = vpop.f32.mrb[17].mxu0  ;;  %v1892_v4 = vmul.f32 %v1876_v45, %v4042_v19  ;;  %v4066_v6 = vadd.f32 %v1778_v49, %v4024_v0 }
 0xb02   : > { %v4069_v7 = vadd.f32 %v1831_v52, %v4026_v11  ;;  %v1782_v13 = vpop.f32.mrb[26].mxu1  ;;  %v1835_v2 = vpop.f32.mrb[18].mxu0  ;;  %v1894_v17 = vmul.f32 %v1878_v58, %v4045_v22  ;;  %v1875_v15 = vmul.f32 %v1859_v44, %v4039_v27  ;;  %v4081_v36 = vadd.f32 %v1780_v61, %v4028_v12 }
 0xb03   : > { %v1920_v1 = vmul.f32 0.7978846, %v1904_v53  ;;  %v1922_v3 = vmul.f32 0.7978846, %v1906_v56  ;;  %v1784_v20 = vpop.f32.mrb[27].mxu1  ;;  %v1837_v21 = vpop.f32.mrb[19].mxu0  ;;  %v1908_v24 = vadd.f32 %v1892_v4, %v4042_v19  ;;  %v4085_v41 = vadd.f32 %v1833_v62, %v4030_v14 }
 0xb04   : > { %v1910_v28 = vadd.f32 %v1894_v17, %v4045_v22  ;;  %v1866_v30 = vmul.f32 0.044715, %v4069_v7  ;;  %v1864_v29 = vmul.f32 0.044715, %v4066_v6  ;;  %v4088_v44 = vadd.f32 %v1782_v13, %v4024_v0 }
 0xb05   : > { %3131 = vtanh.f32 %v1920_v1  ;;  %v1924_v31 = vmul.f32 0.7978846, %v1908_v24  ;;  %v1879_v45 = vmul.f32 %v1863_v25, %v4058_v48  ;;  %v1865_v49 = vmul.f32 0.044715, %v4081_v36 }
 0xb06   : > { %3133 = vtanh.f32 %v1922_v3  ;;  %v1926_v37 = vmul.f32 0.7978846, %v1910_v28  ;;  %v1882_v40 = vmul.f32 %v1866_v30, %v4069_v7  ;;  %v4093_v52 = vadd.f32 %v1835_v2, %v4026_v11 }
 0xb07   : > { %3135 = vtanh.f32 %v1924_v31  ;;  %v1893_v53 = vmul.f32 %v1877_v16, %v4048_v32  ;;  %v1867_v58 = vmul.f32 0.044715, %v4085_v41  ;;  %v1880_v60 = vmul.f32 %v1864_v29, %v4066_v6 }
 0xb08   : > { %3137 = vtanh.f32 %v1926_v37  ;;  %v1898_v56 = vmul.f32 %v1882_v40, %v4069_v7  ;;  %v1868_v0 = vmul.f32 0.044715, %v4088_v44  ;;  %v1870_v61 = vmul.f32 0.044715, %v4093_v52 }
 0xb09   : > { %v4102_v62 = vadd.f32 %v1784_v20, %v4028_v12  ;;  %v1881_v11 = vmul.f32 %v1865_v49, %v4081_v36  ;;  %v1883_v13 = vmul.f32 %v1867_v58, %v4085_v41  ;;  %v4108_v2 = vadd.f32 %v1837_v21, %v4030_v14 }
 0xb0a   : > { %v1914_v4 = vadd.f32 %v1898_v56, %v4069_v7  ;;  %v1844_v1 = vmul.f32 0.5, %v4042_v19  ;;  %v1846_v3 = vmul.f32 0.5, %v4045_v22  ;;  %v1886_v17 = vmul.f32 %v1870_v61, %v4093_v52 }
 0xb0b   : > { %v1869_v24 = vmul.f32 0.044715, %v4102_v62  ;;  %v1891_v12 = vmul.f32 %v1875_v15, %v4039_v27  ;;  %v1895_v20 = vmul.f32 %v1879_v45, %v4058_v48  ;;  %v1871_v28 = vmul.f32 0.044715, %v4108_v2 }
 0xb0c   : > { %v1930_v25 = vmul.f32 0.7978846, %v1914_v4  ;;  %v1896_v16 = vmul.f32 %v1880_v60, %v4066_v6  ;;  %v1902_v14 = vmul.f32 %v1886_v17, %v4093_v52  ;;  %v1905_v19 = vadd.f32 %v1889_v23, %v4035_v18 }
 0xb0d   : > { %v1885_v21 = vmul.f32 %v1869_v24, %v4102_v62  ;;  %v1897_v30 = vmul.f32 %v1881_v11, %v4081_v36  ;;  %v1899_v31 = vmul.f32 %v1883_v13, %v4085_v41  ;;  %v1884_v15 = vmul.f32 %v1868_v0, %v4088_v44 }
 0xb0e   : > { %v1909_v29 = vadd.f32 %v1893_v53, %v4048_v32  ;;  %3139 = vtanh.f32 %v1930_v25  ;;  %v1918_v40 = vadd.f32 %v1902_v14, %v4093_v52  ;;  %v1887_v45 = vmul.f32 %v1871_v28, %v4108_v2 }
 0xb0f   : > { %v3132_v22 = vpop.eup %3131  ;;  %v1921_v49 = vmul.f32 0.7978846, %v1905_v19  ;;  %v1901_v56 = vmul.f32 %v1885_v21, %v4102_v62  ;;  %v1907_v23 = vadd.f32 %v1891_v12, %v4039_v27  ;;  %v1911_v60 = vadd.f32 %v1895_v20, %v4058_v48 }
 0xb10   : > { %v3134_v37 = vpop.eup %3133  ;;  %v1925_v58 = vmul.f32 0.7978846, %v1909_v29  ;;  %v1934_v4 = vmul.f32 0.7978846, %v1918_v40  ;;  %v1952_v0 = vadd.f32 1.0, %v3132_v22  ;;  %v1900_v25 = vmul.f32 %v1884_v15, %v4088_v44 }
 0xb11   : > { %v3136_v61 = vpop.eup %3135  ;;  %3141 = vtanh.f32 %v1921_v49  ;;  %v1954_v11 = vadd.f32 1.0, %v3134_v37  ;;  %v1923_v13 = vmul.f32 0.7978846, %v1907_v23  ;;  %v1927_v17 = vmul.f32 0.7978846, %v1911_v60 }
 0xb12   : > { %v3138_v53 = vpop.eup %3137  ;;  %3143 = vtanh.f32 %v1925_v58  ;;  %v1956_v24 = vadd.f32 1.0, %v3136_v61  ;;  %v1903_v28 = vmul.f32 %v1887_v45, %v4108_v2  ;;  %v1968_v12 = vmul.f32 %v1952_v0, %v4051_v33 }
 0xb13   : > { %3145 = vtanh.f32 %v1934_v4  ;;  %v1958_v14 = vadd.f32 1.0, %v3138_v53  ;;  %v4134_v21 = vmul.f32 %v1954_v11, %v4062_v63  ;;  %v1913_v22 = vadd.f32 %v1897_v30, %v4081_v36 }
 0xb14   : > { %3147 = vtanh.f32 %v1923_v13  ;;  %v1972_v20 = vmul.f32 %v1956_v24, %v1844_v1  ;;  %v1917_v29 = vadd.f32 %v1901_v56, %v4102_v62  ;;  %v1912_v15 = vadd.f32 %v1896_v16, %v4066_v6 }
 0xb15   : > { %3149 = vtanh.f32 %v1927_v17  ;;  %v4136_v19 = vmul.f32 %v1958_v14, %v1846_v3  ;;  %v1929_v45 = vmul.f32 0.7978846, %v1913_v22  ;;  %v1916_v33 = vadd.f32 %v1900_v25, %v4088_v44 }
 0xb16   : > { %v1984_v37 = vpack.c.bf16 %v1972_v20, %v1968_v12  ;;  %v1933_v49 = vmul.f32 0.7978846, %v1917_v29  ;;  %v1928_v1 = vmul.f32 0.7978846, %v1912_v15  ;;  %v1915_v63 = vadd.f32 %v1899_v31, %v4085_v41 }
 0xb17   : > { %v1986_v40 = vpack.c.bf16 %v4136_v19, %v4134_v21  ;;  %3151 = vtanh.f32 %v1929_v45  ;;  %v1932_v3 = vmul.f32 0.7978846, %v1916_v33  ;;  %v1919_v30 = vadd.f32 %v1903_v28, %v4108_v2 }
 0xb18   : > { %v3140_v58 = vpop.eup %3139  ;;  %3153 = vtanh.f32 %v1933_v49  ;;  %v1931_v56 = vmul.f32 0.7978846, %v1915_v63  ;;  %v1841_v11 = vmul.f32 0.5, %v4035_v18  ;;  %v1845_v53 = vmul.f32 0.5, %v4048_v32 }
 0xb19   : > { %3155 = vtanh.f32 %v1928_v1  ;;  %v1935_v16 = vmul.f32 0.7978846, %v1919_v30  ;;  %v1962_v4 = vadd.f32 1.0, %v3140_v58  ;;  %v1850_v17 = vmul.f32 0.5, %v4069_v7 }
 0xb1a   : > { %3157 = vtanh.f32 %v1932_v3  ;;  %v1854_v24 = vmul.f32 0.5, %v4093_v52  ;;  %v1843_v20 = vmul.f32 0.5, %v4039_v27  ;;  %v1847_v19 = vmul.f32 0.5, %v4058_v48 }
 0xb1b   : > { %v3142_v23 = vpop.eup %3141  ;;  %3159 = vtanh.f32 %v1931_v56  ;;  %v1978_v22 = vmul.f32 %v1962_v4, %v1850_v17  ;;  %v1849_v27 = vmul.f32 0.5, %v4081_v36  ;;  %v1853_v48 = vmul.f32 0.5, %v4102_v62 }
 0xb1c   : > { %v3144_v60 = vpop.eup %3143  ;;  %v1953_v61 = vadd.f32 1.0, %v3142_v23  ;;  %3161 = vtanh.f32 %v1935_v16  ;;  %v1848_v30 = vmul.f32 0.5, %v4066_v6  ;;  %v1851_v36 = vmul.f32 0.5, %v4085_v41 }
 0xb1d   : > { %v3146_v0 = vpop.eup %3145  ;;  %v1957_v31 = vadd.f32 1.0, %v3144_v60  ;;  %v1852_v60 = vmul.f32 0.5, %v4088_v44  ;;  %v1855_v62 = vmul.f32 0.5, %v4108_v2 }
 0xb1e   : > { %v3148_v13 = vpop.eup %3147  ;;  %v1966_v25 = vadd.f32 1.0, %v3146_v0  ;;  %v1969_v14 = vmul.f32 %v1953_v61, %v1841_v11 }
 0xb1f   : > { %v3150_v28 = vpop.eup %3149  ;;  %v1973_v12 = vmul.f32 %v1957_v31, %v1845_v53  ;;  %v1955_v21 = vadd.f32 1.0, %v3148_v13 }
 0xb20   : > { %v1959_v18 = vadd.f32 1.0, %v3150_v28  ;;  %v1982_v32 = vmul.f32 %v1966_v25, %v1854_v24 }
 0xb21   : > { %v1985_v29 = vpack.c.bf16 %v1973_v12, %v1969_v14  ;;  %v1971_v15 = vmul.f32 %v1955_v21, %v1843_v20  ;;  %v3152_v7 = vpop.eup %3151 }
 0xb22   : > { %v1975_v45 = vmul.f32 %v1959_v18, %v1847_v19  ;;  %v1990_v49 = vpack.c.bf16 %v1982_v32, %v1978_v22  ;;  %v3154_v52 = vpop.eup %3153  ;;  %v1961_v1 = vadd.f32 1.0, %v3152_v7 }
 0xb23   : > { %2287 = vmatprep.mubr.bf16.mxu1 %v1985_v29  ;;  %v3156_v63 = vpop.eup %3155  ;;  %v1965_v58 = vadd.f32 1.0, %v3154_v52 }
 0xb24   : > { %v1987_v33 = vpack.c.bf16 %v1975_v45, %v1971_v15  ;;  %2288 = vmatmul.mubr.bf16.vlgmr.msra.gmra.mrb[28].mxu1 %v1984_v37  ;;  %v3158_v3 = vpop.eup %3157  ;;  %v1960_v56 = vadd.f32 1.0, %v3156_v63  ;;  %v1977_v16 = vmul.f32 %v1961_v1, %v1849_v27 }
 0xb25   : > { %2861 = vmatpush3.bf16.msra.mxu1 %v3976_v26  ;;  %v3160_v23 = vpop.eup %3159  ;;  %v1981_v37 = vmul.f32 %v1965_v58, %v1853_v48  ;;  %v1964_v61 = vadd.f32 1.0, %v3158_v3 }
 0xb26   : > { %2336 = vmatprep.mubr.bf16.mxu0 %v1987_v33  ;;  %2854 = vmatprep.subr.bf16.mxu1 %v3979_v34  ;;  %v3162_v26 = vpop.eup %3161  ;;  %v1963_v4 = vadd.f32 1.0, %v3160_v23  ;;  %v1976_v34 = vmul.f32 %v1960_v56, %v1848_v30 }
 0xb27   : > { %2337 = vmatmul.mubr.bf16.vlgmr.msra.gmra.mrb[20].mxu0 %v1986_v40  ;;  %v1989_v0 = vpack.c.bf16 %v1981_v37, %v1977_v16  ;;  %v1980_v11 = vmul.f32 %v1964_v61, %v1852_v60  ;;  %v1967_v6 = vadd.f32 1.0, %v3162_v26 }
 0xb28   : > { %v1979_v53 = vmul.f32 %v1963_v4, %v1851_v36 }
 0xb29   : > { %2862 = vmatpush3.bf16.msra.mxu1 %v3981_v35  ;;  %2295 = vmatprep.mubr.bf16.mxu1 %v1989_v0  ;;  %v1988_v40 = vpack.c.bf16 %v1980_v11, %v1976_v34  ;;  %v1983_v31 = vmul.f32 %v1967_v6, %v1855_v62 }
 0xb2a   : > { %2855 = vmatprep.subr.bf16.mxu1 %v3985_v38  ;;  %v2602_v38 = vld [vmem:[%s4297_s28] ss:$0 sm:$0xff] }
 0xb2b   : > { %v1991_v44 = vpack.c.bf16 %v1983_v31, %v1979_v53 }
 0xb2c   : > { %2296 = vmatmul.mubr.bf16.gmra.mrb[32].mxu1 %v1988_v40 }
 0xb2d   : > { %2863 = vmatpush3.bf16.msra.mxu1 %v3988_v39  ;;  %2344 = vmatprep.mubr.bf16.mxu1 %v1991_v44 }
 0xb2e   : > { %2856 = vmatprep.subr.bf16.mxu1 %v3991_v42 }
 0xb31   : > { %2864 = vmatpush3.bf16.msra.mxu1 %v3993_v43 }
 0xb32   : > { %2857 = vmatprep.subr.bf16.mxu1 %v3997_v46 }
 0xb35   : > { %2865 = vmatpush3.bf16.msra.mxu1 %v3999_v47 }
 0xb36   : > { %2858 = vmatprep.subr.bf16.mxu1 %v4003_v50 }
 0xb39   : > { %2866 = vmatpush3.bf16.msra.mxu1 %v4005_v51 }
 0xb3a   : > { %2859 = vmatprep.subr.bf16.mxu1 %v4008_v54 }
 0xb3d   : > { %2867 = vmatpush3.bf16.msra.mxu1 %v4011_v55 }
 0xb3e   : > { %2860 = vmatprep.subr.bf16.mxu1 %v4014_v57 }
 0xb41   : > { %2868 = vmatpush3.bf16.msra.mxu1 %v4017_v59 }
 0xb44   : > { %2345 = vmatmul.mubr.bf16.vlgmr.msra.gmra.mrb[36].mxu1 %v1990_v49 }
 0xbf7   : > { %v2709_v35 = vpop.f32.mrb[28].mxu1 }
 0xbf8   : > { %v2710_v39 = vpop.f32.mrb[29].mxu1 }
 0xbf9   : > { %v2711_v42 = vadd.f32 %v2710_v39, %v2709_v35  ;;  %v2712_v43 = vpop.f32.mrb[30].mxu1 }
 0xbfa   : > { %v2737_v46 = vpop.f32.mrb[20].mxu0  ;;  %v2713_v47 = vpop.f32.mrb[31].mxu1 }
 0xbfb   : > { %v2290_v50 = vadd.f32 %v2711_v42, %v2602_v38  ;;  %v2738_v51 = vpop.f32.mrb[21].mxu0  ;;  %v2714_v54 = vadd.f32 %v2713_v47, %v2712_v43 }
 0xbfc   : > { %v2739_v55 = vadd.f32 %v2738_v51, %v2737_v46  ;;  %v2740_v41 = vpop.f32.mrb[22].mxu0 }
 0xbfd   : > { %v2293_v57 = vadd.f32 %v2714_v54, %v2602_v38  ;;  %v2741_v2 = vpop.f32.mrb[23].mxu0 }
 0xbfe   : > { %v2339_v59 = vadd.f32 %v2739_v55, %v2290_v50  ;;  %v2742_v13 = vadd.f32 %v2741_v2, %v2740_v41 }
 0xbff   : > { %v2715_v25 = vpop.f32.mrb[32].mxu1 }
 0xc00   : > { %v2353_v17 = vadd.f32 %v2339_v59, %v3931_v5  ;;  %v2342_v24 = vadd.f32 %v2742_v13, %v2293_v57  ;;  %v2716_v28 = vpop.f32.mrb[33].mxu1 }
 0xc01   : > { %v2717_v12 = vadd.f32 %v2716_v28, %v2715_v25  ;;  %v2718_v20 = vpop.f32.mrb[34].mxu1 }
 0xc02   : > { %2357 = vst [vmem:[%s654_s16] sm:$0xff] %v2353_v17  ;;  %v2354_v14 = vadd.f32 %v2342_v24, %v3934_v8  ;;  %v2719_v21 = vpop.f32.mrb[35].mxu1 }
 0xc03   : > { %v2720_v19 = vadd.f32 %v2719_v21, %v2718_v20  ;;  %v2298_v32 = vadd.f32 %v2717_v12, %v2602_v38 }
 0xc04   : > { %2358 = vst [vmem:[%s654_s16 + $0x8] sm:$0xff] %v2354_v14 }
 0xc05   : > { %v2301_v45 = vadd.f32 %v2720_v19, %v2602_v38 }
 0xc17   : > { %v2743_v18 = vpop.f32.mrb[36].mxu1 }
 0xc18   : > { %v2744_v22 = vpop.f32.mrb[37].mxu1 }
 0xc19   : > { %v2745_v29 = vadd.f32 %v2744_v22, %v2743_v18  ;;  %v2746_v5 = vpop.f32.mrb[38].mxu1 }
 0xc1a   : > { %v2747_v15 = vpop.f32.mrb[39].mxu1 }
 0xc1b   : > { %v2347_v49 = vadd.f32 %v2745_v29, %v2298_v32  ;;  %v2748_v7 = vadd.f32 %v2747_v15, %v2746_v5 }
 0xc1d   : > { %v2355_v8 = vadd.f32 %v2347_v49, %v3938_v9  ;;  %v2350_v52 = vadd.f32 %v2748_v7, %v2301_v45 }
 0xc1f   : > { %2359 = vst [vmem:[%s654_s16 + $0x10] sm:$0xff] %v2355_v8  ;;  %v2356_v33 = vadd.f32 %v2350_v52, %v3942_v10 }
 0xc21   : > { %2360 = vst [vmem:[%s654_s16 + $0x18] sm:$0xff] %v2356_v33 }
 0xc22   : > { %3374 = shalt.err (!%p3371_p8)
}
 0xc23   : > { %s3375_s17 = scalar_lea.hbm %s4187_s19, 512  ;;  %s3379_s12 = scalar_lea.hbm %s4298_s10, 1024 }
 0xc24   : > { %p3376_p4 = scmp.ne.s32.totalorder %s4187_s19, %s3375_s17  ;;  %p3380_p3 = scmp.lt.u32.totalorder %s4187_s19, %s4298_s10 }
 0xc25   : > { %p3381_p5 = scmp.lt.u32.totalorder %s3379_s12, %s3375_s17  ;;  %p3383_p6 = scmp.lt.u32.totalorder %s3375_s17, %s4187_s19 }
 0xc26   : > { %p3377_p10 = pnand %p3376_p4, %p4299_p9 }
 0xc27   : > { %p3382_p7 = por %p3381_p5, %p3380_p3 }
 0xc28   : > { %p3378_p11 = pneg %p3377_p10 }
 0xc29   : > { %p3384_p12 = por %p3383_p6, %p3382_p7 }
 0xc2b   : > { %p3385_p1 = pnand %p3384_p12, %p3378_p11 }
 0xc2d   : > { %3388 = shalt.err (!%p3385_p1)
}
 0xc2e   : > { %s3458_s14 = smov 128   ;;  %s3459_s0 = smov 8  }
 0xc2f   : > { %2895 = dma.vmem_to_hbm [thread:$0]  (%p4299_p9), %s4181_s1, 512, %s4187_s19, %s2362_s7, %s3458_s14, %s3458_s14, %s3459_s0  }
 0xc30 PF: > { %s2391_s20 = sand.u32 1, %s3427_s24   ;;  %p4300_p13 = scmp.ne.s32.totalorder %s4281_s29, 0 }
 0xc31   : > { %p4301_p0 = scmp.ge.s32.totalorder %s3439_s27, 2  ;;  %s2392_s30 = scalar_lea.sflag [#allocation5], %s2391_s20 }
 0xc33   : > { %p2921_p2 = pnand %p4301_p0, %p4300_p13 }
 0xc35   : > { %3422 = dma.done.wait (!%p2921_p2), %s2392_s30, 512  }
 0xc36   : > { %3424 = vsyncadd (!%p2921_p2), %s2392_s30, 4294966784  ;;  %p33_p8 = scmp.ge.s32.totalorder %s3741_s18, 4   ;;  %s4302_s24 = smov %s3431_s25 }
 0xc37   : > { %s4303_s25 = smov %s3435_s26  ;;  %s4304_s26 = smov %s3752_s21 }
 0xc38   : > { %s4305_s27 = smov %s3741_s18  ;;  %35 = sbr.rel (!%p33_p8) target bundleno = 20 (0x14), region = 157 }
 0xc3f   :  { %2397 = vsyncpa [#allocation4], 1 }
 0xc40   :  { %2399 = vsyncpa [#allocation4 + $0x1], 1 }
 0xc41   :  { %2400 = vsyncpa [#allocation7], 1 }
 0xc42   :  { %2401 = vsyncpa [#allocation10], 1 }
 0xc43   :  { %2402 = vsyncpa [#allocation13], 1 }
 0xc44   :  { %2403 = vsyncpa [#allocation5], 1 }
 0xc45   :  { %2405 = vsyncpa [#allocation5 + $0x1], 1 }

</bundles_post_ra>
